<compile_context>
chip_gen: v5e
topology: v5e:2x2
jax: 0.10.0
libtpu: 0.0.40
codegen_flags: <defaults>
</compile_context>

<pallas_src>
import jax
import jax.numpy as jnp
from jax.experimental import pallas as pl
from jax.experimental.pallas import tpu as pltpu

# ----------------------------- config (args) ----------------------------------
N_RESBLOCKS = 2
N_FEATS = 16
COMPRESS = 2
RES_SCALE = 1.0
RGB_RANGE = 1.0
RGB_MEAN = (0.4488, 0.4371, 0.4040)

MATMUL_DTYPE = jnp.bfloat16            # MXU operand dtype (f32 accumulation)
N_LAYERS = 2 * N_RESBLOCKS + 3         # head + 2*resblocks + tail conv + tail-up conv
LANE = 128


# --------------------------- layout helpers (XLA glue) -------------------------
def space_to_depth(x, r):
    n, h, w, c = x.shape
    x = x.reshape(n, h // r, r, w // r, r, c)
    x = jnp.transpose(x, (0, 1, 3, 2, 4, 5))
    return x.reshape(n, h // r, w // r, r * r * c)


def depth_to_space(x, r):
    n, h, w, crr = x.shape
    c = crr // (r * r)
    x = x.reshape(n, h, w, r, r, c)
    x = jnp.transpose(x, (0, 1, 3, 2, 4, 5))
    return x.reshape(n, h * r, w * r, c)


def _round_up(x, m):
    return (x + m - 1) // m * m


def _vmem_limit_bytes():
    # ~75% of physical VMEM, capped at 96 MiB (v5e/v6e: 128 MiB phys, v7x: 64 MiB).
    try:
        cap = int(pltpu.get_tpu_info().vmem_capacity_bytes)
        return max(32 * 1024 * 1024, min(96 * 1024 * 1024, (cap * 3) // 4))
    except Exception:
        return 32 * 1024 * 1024        # conservative known-good default


# ------------------------------ fused FEQE kernel ------------------------------
def make_feqe_kernel(wp, cp, m_pad):
    """One grid step == one batch tile, folded onto the lane axis.

    Activation layout: (cp channels on sublanes, m_pad flattened padded pixels on
    lanes).  Each image occupies a contiguous (hs+2)*(ws+2) lane range with a zero
    1-pixel halo, so a 3x3 conv tap at offset (dh,dw) is a static lane shift by
    dh*wp+dw; the 9 shifted copies are stacked on sublanes into a (9*cp, m_pad)
    bf16 patch matrix and contracted with the (cp, 9*cp) weights in ONE MXU matmul
    whose output (cp, m_pad) is lane-dense.
    """
    ext = wp + 1                                         # max |tap offset|

    def conv3x3(h_f32, w_ref, b_ref, mask, layer, relu=False, mask_out=True):
        a = h_f32.astype(MATMUL_DTYPE)                   # single narrow cast per conv
        z = jnp.zeros((cp, ext), MATMUL_DTYPE)
        a_ext = jnp.concatenate([z, a, z], axis=1)       # (cp, m_pad + 2*ext)
        taps = []
        for dh in (-1, 0, 1):
            for dw in (-1, 0, 1):
                if dh == 0 and dw == 0:
                    taps.append(a)
                else:
                    s = ext + dh * wp + dw               # static lane offset
                    taps.append(a_ext[:, s:s + m_pad])
        patches = jnp.concatenate(taps, axis=0)          # (9*cp, m_pad) bf16
        y = jnp.dot(w_ref[layer], patches,
                    preferred_element_type=jnp.float32)  # (cp, m_pad) f32 on MXU
        y = y + b_ref[layer]                             # (cp, 1) lane-broadcast
        if relu:
            y = jnp.maximum(y, 0.0)
        if mask_out:
            y = y * mask                                 # re-zero halo / pad lanes
        return y

    def kernel(x_ref, w_ref, b_ref, mean_ref, mask_ref, o_ref):
        x = x_ref[0]                                     # (cp, m_pad) raw packed input
        mask = mask_ref[...]                             # (1, m_pad) interior mask
        xm = (x - mean_ref[...]) * mask                  # sub_mean, keep halo == 0

        h = conv3x3(xm, w_ref, b_ref, mask, 0)           # head (EDownsampler conv)

        layer = 1
        for _ in range(N_RESBLOCKS):                     # ResBlocks
            t = conv3x3(h, w_ref, b_ref, mask, layer, relu=True)
            r = conv3x3(t, w_ref, b_ref, mask, layer + 1)
            if RES_SCALE != 1.0:
                r = r * RES_SCALE
            h = h + r
            layer += 2

        t = conv3x3(h, w_ref, b_ref, mask, layer)                    # tail conv
        u = conv3x3(t, w_ref, b_ref, mask, layer + 1, mask_out=False)  # tail up conv
        # (last layer's halo lanes are discarded by the wrapper -> no mask needed)

        # global skip: tail(...) + (x - mean) + mean == tail(...) + x (mean cancels)
        o_ref[0] = (u + x).astype(o_ref.dtype)

    return kernel


def pack_params(params, cp):
    """Pack weights into (L, cp, 9*cp) bf16 (transposed: rows=cout) + (L, cp, 1) f32 bias."""
    names = [("head_w", "head_b")]
    for i in range(N_RESBLOCKS):
        names.append((f"body{i}_w1", f"body{i}_b1"))
        names.append((f"body{i}_w2", f"body{i}_b2"))
    names.append(("tail_w1", "tail_b1"))
    names.append(("tail_up_w", "tail_up_b"))

    ws, bs = [], []
    for wn, bn in names:
        w = params[wn]                                   # (3, 3, cin, cout) HWIO
        b = params[bn]                                   # (cout,)
        cin, cout = w.shape[2], w.shape[3]
        w = jnp.pad(w, ((0, 0), (0, 0), (0, cp - cin), (0, cp - cout)))
        b = jnp.pad(b, ((0, cp - cout),))
        # contraction index k = (kh*3+kw)*cp + ci ; output row = cout
        ws.append(w.reshape(9 * cp, cp).T)               # (cp, 9*cp)
        bs.append(b.reshape(cp, 1))
    return (jnp.stack(ws).astype(MATMUL_DTYPE),          # (L, cp, 9*cp)
            jnp.stack(bs).astype(jnp.float32))           # (L, cp, 1)


# ------------------------------ parameters -------------------------------------
def init_params(key):
    c2 = COMPRESS * COMPRESS
    shapes = {
        "head_w": (3, 3, 3 * c2, N_FEATS), "head_b": (N_FEATS,),
        "tail_w1": (3, 3, N_FEATS, N_FEATS), "tail_b1": (N_FEATS,),
        "tail_up_w": (3, 3, N_FEATS, 3 * c2), "tail_up_b": (3 * c2,),
    }
    for i in range(N_RESBLOCKS):
        shapes[f"body{i}_w1"] = (3, 3, N_FEATS, N_FEATS)
        shapes[f"body{i}_b1"] = (N_FEATS,)
        shapes[f"body{i}_w2"] = (3, 3, N_FEATS, N_FEATS)
        shapes[f"body{i}_b2"] = (N_FEATS,)
    params = {}
    names = sorted(shapes)
    keys = jax.random.split(key, len(names))
    for k, name in zip(keys, names):
        shp = shapes[name]
        if len(shp) == 1:                                # bias: small random (exercised path)
            params[name] = 0.01 * jax.random.normal(k, shp, jnp.float32)
        else:
            fan_in = shp[0] * shp[1] * shp[2]
            params[name] = (jax.random.normal(k, shp, jnp.float32)
                            / jnp.sqrt(jnp.float32(fan_in)))
    return params


# ------------------------------ FEQE forward ------------------------------------
@jax.jit
def feqe_forward(x_nchw, params):
    n, c, h, w = x_nchw.shape
    r = COMPRESS
    assert c == 3 and h % r == 0 and w % r == 0, "FEQE expects RGB, H/W divisible by compress"
    hs, ws = h // r, w // r
    hp, wp = hs + 2, ws + 2                              # 1-pixel conv halo
    c_pack = c * r * r                                   # 12 packed channels
    cp = max(N_FEATS, _round_up(c_pack, 8))              # 16: unified sublane channel width

    per_img = hp * wp
    # fold enough images into one tile that M (lanes / MXU columns) is >= 256
    bt = min(n, max(1, (2 * LANE + per_img - 1) // per_img))
    g = (n + bt - 1) // bt
    n_pad = g * bt
    m_real = bt * per_img
    m_pad = _round_up(m_real, LANE)

    # ---- layout plumbing (XLA): NCHW -> packed, spatially padded, channels-on-sublanes
    x = jnp.transpose(x_nchw, (0, 2, 3, 1)).astype(jnp.float32)      # NCHW -> NHWC
    x_sd = space_to_depth(x, r)                                      # (n, hs, ws, 12)
    x_sd = jnp.pad(x_sd, ((0, n_pad - n), (1, 1), (1, 1), (0, cp - c_pack)))
    x_pk = jnp.transpose(x_sd.reshape(g, bt, hp, wp, cp), (0, 4, 1, 2, 3))
    x_pk = x_pk.reshape(g, cp, m_real)
    x_pk = jnp.pad(x_pk, ((0, 0), (0, 0), (0, m_pad - m_real)))      # (g, cp, m_pad)

    w_all, b_all = pack_params(params, cp)
    mean = jnp.tile(RGB_RANGE * jnp.asarray(RGB_MEAN, jnp.float32), r * r)
    mean = jnp.pad(mean, (0, cp - c_pack)).reshape(cp, 1)

    m_img = jnp.zeros((hp, wp), jnp.float32).at[1:-1, 1:-1].set(1.0)  # 1=interior, 0=halo
    mask = jnp.tile(m_img.reshape(-1), bt)
    mask = jnp.pad(mask, (0, m_pad - m_real)).reshape(1, m_pad)

    kernel = make_feqe_kernel(wp, cp, m_pad)
    y_pk = pl.pallas_call(
        kernel,
        out_shape=jax.ShapeDtypeStruct((g, cp, m_pad), jnp.float32),
        grid=(g,),
        in_specs=[
            pl.BlockSpec((1, cp, m_pad), lambda i: (i, 0, 0)),          # packed batch tile
            pl.BlockSpec((N_LAYERS, cp, 9 * cp), lambda i: (0, 0, 0)),  # all weights
            pl.BlockSpec((N_LAYERS, cp, 1), lambda i: (0, 0, 0)),       # all biases
            pl.BlockSpec((cp, 1), lambda i: (0, 0)),                    # packed rgb mean
            pl.BlockSpec((1, m_pad), lambda i: (0, 0)),                 # interior mask
        ],
        out_specs=pl.BlockSpec((1, cp, m_pad), lambda i: (i, 0, 0)),
        compiler_params=pltpu.CompilerParams(
            dimension_semantics=("parallel",),           # batch tiles shard across TCs
            vmem_limit_bytes=_vmem_limit_bytes()),
    )(x_pk, w_all, b_all, mean, mask)

    # ---- unpack: (g, cp, m_pad) -> NCHW ----
    y = y_pk[:, :c_pack, :m_real].reshape(g, c_pack, bt, hp, wp)
    y = jnp.transpose(y, (0, 2, 3, 4, 1)).reshape(n_pad, hp, wp, c_pack)
    y = y[:n, 1:-1, 1:-1, :]                             # drop halo + batch padding
    y = depth_to_space(y, r)                             # == depth_to_space(tail_out) + x
    return jnp.transpose(y, (0, 3, 1, 2))                # NHWC -> NCHW


# ------------------------- pure-JAX reference (for checking) --------------------
def feqe_reference(x_nchw, params):
    def conv(x, w, b):
        y = jax.lax.conv_general_dilated(
            x, w, window_strides=(1, 1), padding="SAME",
            dimension_numbers=("NHWC", "HWIO", "NHWC"))
        return y + b

    r = COMPRESS
    mean = RGB_RANGE * jnp.asarray(RGB_MEAN, jnp.float32)
    x = jnp.transpose(x_nchw, (0, 2, 3, 1)).astype(jnp.float32)
    xs = x - mean
    h = conv(space_to_depth(xs, r), params["head_w"], params["head_b"])
    for i in range(N_RESBLOCKS):
        t = jax.nn.relu(conv(h, params[f"body{i}_w1"], params[f"body{i}_b1"]))
        h = h + RES_SCALE * conv(t, params[f"body{i}_w2"], params[f"body{i}_b2"])
    t = conv(h, params["tail_w1"], params["tail_b1"])
    t = conv(t, params["tail_up_w"], params["tail_up_b"])
    y = depth_to_space(t, r) + xs + mean
    return jnp.transpose(y, (0, 3, 1, 2))


# ---------------------------------- main -----------------------------------------
if __name__ == "__main__":
    key = jax.random.PRNGKey(0)
    k_x, k_p = jax.random.split(key)

    N, C, H, W = 2, 3, 16, 16
    x = jax.random.uniform(k_x, (N, C, H, W), jnp.float32) * RGB_RANGE
    params = init_params(k_p)

    y = feqe_forward(x, params)
    y = jax.block_until_ready(y)

    assert y.shape == (N, C, H, W), y.shape
    assert bool(jnp.all(jnp.isfinite(y)))

    # correctness vs. pure-JAX/XLA reference (bf16 MXU operands -> loose tolerance)
    y_ref = feqe_reference(x, params)
    max_err = float(jnp.max(jnp.abs(y - y_ref)))
    assert max_err < 1e-1, f"max abs err vs reference: {max_err}"

    print("KERNEL_OK")
</pallas_src>

<mosaic_0001>
module attributes {stable_mosaic.version = 11 : i64} {
  func.func @kernel(%arg0: i32, %arg1: memref<1x16x256xf32, #tpu.memory_space<vmem>>, %arg2: memref<7x16x144xbf16, #tpu.memory_space<vmem>>, %arg3: memref<7x16x1xf32, #tpu.memory_space<vmem>>, %arg4: memref<16x1xf32, #tpu.memory_space<vmem>>, %arg5: memref<1x256xf32, #tpu.memory_space<vmem>>, %arg6: memref<1x16x256xf32, #tpu.memory_space<vmem>>) attributes {dimension_semantics = [#tpu.dimension_semantics<parallel>], iteration_bounds = array<i64: 1>, scalar_prefetch = 0 : i64, scratch_operands = 0 : i64, tpu.core_type = #tpu.core_type<tc>, window_params = [{transform_indices = @transform_0, window_bounds = array<i64: 1, 16, 256>}, {pipeline_mode = #tpu.pipeline_mode<synchronous>, transform_indices = @transform_1, window_bounds = array<i64: 7, 16, 144>}, {pipeline_mode = #tpu.pipeline_mode<synchronous>, transform_indices = @transform_2, window_bounds = array<i64: 7, 16, 1>}, {pipeline_mode = #tpu.pipeline_mode<synchronous>, transform_indices = @transform_3, window_bounds = array<i64: 16, 1>}, {pipeline_mode = #tpu.pipeline_mode<synchronous>, transform_indices = @transform_4, window_bounds = array<i64: 1, 256>}, {transform_indices = @transform_5, window_bounds = array<i64: 1, 16, 256>}]} {
    %c0 = arith.constant 0 : index
    %c0_0 = arith.constant 0 : index
    %c0_1 = arith.constant 0 : index
    %0 = vector.load %arg1[%c0, %c0_0, %c0_1] : memref<1x16x256xf32, #tpu.memory_space<vmem>>, vector<1x16x256xf32>
    %1 = vector.shape_cast %0 : vector<1x16x256xf32> to vector<16x256xf32>
    %c0_2 = arith.constant 0 : index
    %c0_3 = arith.constant 0 : index
    %2 = vector.load %arg5[%c0_2, %c0_3] : memref<1x256xf32, #tpu.memory_space<vmem>>, vector<1x256xf32>
    %c0_4 = arith.constant 0 : index
    %c0_5 = arith.constant 0 : index
    %3 = vector.load %arg4[%c0_4, %c0_5] : memref<16x1xf32, #tpu.memory_space<vmem>>, vector<16x1xf32>
    %4 = vector.broadcast %3 : vector<16x1xf32> to vector<16x256xf32>
    %5 = arith.subf %1, %4 : vector<16x256xf32>
    %6 = vector.broadcast %2 : vector<1x256xf32> to vector<16x256xf32>
    %7 = arith.mulf %5, %6 : vector<16x256xf32>
    %8 = arith.truncf %7 : vector<16x256xf32> to vector<16x256xbf16>
    %cst = arith.constant 0.000000e+00 : bf16
    %9 = vector.broadcast %cst : bf16 to vector<16x11xbf16>
    %10 = tpu.concatenate %9, %8, %9 in 1 : vector<16x11xbf16>, vector<16x256xbf16>, vector<16x11xbf16> -> vector<16x278xbf16>
    %11 = vector.extract_strided_slice %10 {offsets = [0, 0], sizes = [16, 256], strides = [1, 1]} : vector<16x278xbf16> to vector<16x256xbf16>
    %12 = vector.extract_strided_slice %10 {offsets = [0, 1], sizes = [16, 256], strides = [1, 1]} : vector<16x278xbf16> to vector<16x256xbf16>
    %13 = vector.extract_strided_slice %10 {offsets = [0, 2], sizes = [16, 256], strides = [1, 1]} : vector<16x278xbf16> to vector<16x256xbf16>
    %14 = vector.extract_strided_slice %10 {offsets = [0, 10], sizes = [16, 256], strides = [1, 1]} : vector<16x278xbf16> to vector<16x256xbf16>
    %15 = vector.extract_strided_slice %10 {offsets = [0, 12], sizes = [16, 256], strides = [1, 1]} : vector<16x278xbf16> to vector<16x256xbf16>
    %16 = vector.extract_strided_slice %10 {offsets = [0, 20], sizes = [16, 256], strides = [1, 1]} : vector<16x278xbf16> to vector<16x256xbf16>
    %17 = vector.extract_strided_slice %10 {offsets = [0, 21], sizes = [16, 256], strides = [1, 1]} : vector<16x278xbf16> to vector<16x256xbf16>
    %18 = vector.extract_strided_slice %10 {offsets = [0, 22], sizes = [16, 256], strides = [1, 1]} : vector<16x278xbf16> to vector<16x256xbf16>
    %19 = tpu.concatenate %11, %12, %13, %14, %8, %15, %16, %17, %18 in 0 : vector<16x256xbf16>, vector<16x256xbf16>, vector<16x256xbf16>, vector<16x256xbf16>, vector<16x256xbf16>, vector<16x256xbf16>, vector<16x256xbf16>, vector<16x256xbf16>, vector<16x256xbf16> -> vector<144x256xbf16>
    %c0_6 = arith.constant 0 : index
    %c0_7 = arith.constant 0 : index
    %c0_8 = arith.constant 0 : index
    %20 = vector.load %arg2[%c0_6, %c0_7, %c0_8] : memref<7x16x144xbf16, #tpu.memory_space<vmem>>, vector<1x16x144xbf16>
    %21 = vector.shape_cast %20 : vector<1x16x144xbf16> to vector<16x144xbf16>
    %cst_9 = arith.constant dense<0.000000e+00> : vector<16x256xf32>
    %22 = tpu.matmul %21, %19, %cst_9 {dimension_numbers = #tpu.dot_dimension_numbers<[1], [0], [0], [1], [0, 0, 1, 1], [], []>} : vector<16x144xbf16>, vector<144x256xbf16>, vector<16x256xf32> -> vector<16x256xf32>
    %c0_10 = arith.constant 0 : index
    %c0_11 = arith.constant 0 : index
    %c0_12 = arith.constant 0 : index
    %23 = vector.load %arg3[%c0_10, %c0_11, %c0_12] : memref<7x16x1xf32, #tpu.memory_space<vmem>>, vector<1x16x1xf32>
    %24 = vector.shape_cast %23 : vector<1x16x1xf32> to vector<16x1xf32>
    %25 = vector.broadcast %24 : vector<16x1xf32> to vector<16x256xf32>
    %26 = arith.addf %22, %25 : vector<16x256xf32>
    %27 = vector.broadcast %2 : vector<1x256xf32> to vector<16x256xf32>
    %28 = arith.mulf %26, %27 : vector<16x256xf32>
    %29 = arith.truncf %28 : vector<16x256xf32> to vector<16x256xbf16>
    %cst_13 = arith.constant 0.000000e+00 : bf16
    %30 = vector.broadcast %cst_13 : bf16 to vector<16x11xbf16>
    %31 = tpu.concatenate %30, %29, %30 in 1 : vector<16x11xbf16>, vector<16x256xbf16>, vector<16x11xbf16> -> vector<16x278xbf16>
    %32 = vector.extract_strided_slice %31 {offsets = [0, 0], sizes = [16, 256], strides = [1, 1]} : vector<16x278xbf16> to vector<16x256xbf16>
    %33 = vector.extract_strided_slice %31 {offsets = [0, 1], sizes = [16, 256], strides = [1, 1]} : vector<16x278xbf16> to vector<16x256xbf16>
    %34 = vector.extract_strided_slice %31 {offsets = [0, 2], sizes = [16, 256], strides = [1, 1]} : vector<16x278xbf16> to vector<16x256xbf16>
    %35 = vector.extract_strided_slice %31 {offsets = [0, 10], sizes = [16, 256], strides = [1, 1]} : vector<16x278xbf16> to vector<16x256xbf16>
    %36 = vector.extract_strided_slice %31 {offsets = [0, 12], sizes = [16, 256], strides = [1, 1]} : vector<16x278xbf16> to vector<16x256xbf16>
    %37 = vector.extract_strided_slice %31 {offsets = [0, 20], sizes = [16, 256], strides = [1, 1]} : vector<16x278xbf16> to vector<16x256xbf16>
    %38 = vector.extract_strided_slice %31 {offsets = [0, 21], sizes = [16, 256], strides = [1, 1]} : vector<16x278xbf16> to vector<16x256xbf16>
    %39 = vector.extract_strided_slice %31 {offsets = [0, 22], sizes = [16, 256], strides = [1, 1]} : vector<16x278xbf16> to vector<16x256xbf16>
    %40 = tpu.concatenate %32, %33, %34, %35, %29, %36, %37, %38, %39 in 0 : vector<16x256xbf16>, vector<16x256xbf16>, vector<16x256xbf16>, vector<16x256xbf16>, vector<16x256xbf16>, vector<16x256xbf16>, vector<16x256xbf16>, vector<16x256xbf16>, vector<16x256xbf16> -> vector<144x256xbf16>
    %c1 = arith.constant 1 : index
    %c0_14 = arith.constant 0 : index
    %c0_15 = arith.constant 0 : index
    %41 = vector.load %arg2[%c1, %c0_14, %c0_15] : memref<7x16x144xbf16, #tpu.memory_space<vmem>>, vector<1x16x144xbf16>
    %42 = vector.shape_cast %41 : vector<1x16x144xbf16> to vector<16x144xbf16>
    %cst_16 = arith.constant dense<0.000000e+00> : vector<16x256xf32>
    %43 = tpu.matmul %42, %40, %cst_16 {dimension_numbers = #tpu.dot_dimension_numbers<[1], [0], [0], [1], [0, 0, 1, 1], [], []>} : vector<16x144xbf16>, vector<144x256xbf16>, vector<16x256xf32> -> vector<16x256xf32>
    %c1_17 = arith.constant 1 : index
    %c0_18 = arith.constant 0 : index
    %c0_19 = arith.constant 0 : index
    %44 = vector.load %arg3[%c1_17, %c0_18, %c0_19] : memref<7x16x1xf32, #tpu.memory_space<vmem>>, vector<1x16x1xf32>
    %45 = vector.shape_cast %44 : vector<1x16x1xf32> to vector<16x1xf32>
    %46 = vector.broadcast %45 : vector<16x1xf32> to vector<16x256xf32>
    %47 = arith.addf %43, %46 : vector<16x256xf32>
    %cst_20 = arith.constant 0.000000e+00 : f32
    %48 = vector.broadcast %cst_20 : f32 to vector<16x256xf32>
    %49 = arith.maximumf %47, %48 : vector<16x256xf32>
    %50 = vector.broadcast %2 : vector<1x256xf32> to vector<16x256xf32>
    %51 = arith.mulf %49, %50 : vector<16x256xf32>
    %52 = arith.truncf %51 : vector<16x256xf32> to vector<16x256xbf16>
    %cst_21 = arith.constant 0.000000e+00 : bf16
    %53 = vector.broadcast %cst_21 : bf16 to vector<16x11xbf16>
    %54 = tpu.concatenate %53, %52, %53 in 1 : vector<16x11xbf16>, vector<16x256xbf16>, vector<16x11xbf16> -> vector<16x278xbf16>
    %55 = vector.extract_strided_slice %54 {offsets = [0, 0], sizes = [16, 256], strides = [1, 1]} : vector<16x278xbf16> to vector<16x256xbf16>
    %56 = vector.extract_strided_slice %54 {offsets = [0, 1], sizes = [16, 256], strides = [1, 1]} : vector<16x278xbf16> to vector<16x256xbf16>
    %57 = vector.extract_strided_slice %54 {offsets = [0, 2], sizes = [16, 256], strides = [1, 1]} : vector<16x278xbf16> to vector<16x256xbf16>
    %58 = vector.extract_strided_slice %54 {offsets = [0, 10], sizes = [16, 256], strides = [1, 1]} : vector<16x278xbf16> to vector<16x256xbf16>
    %59 = vector.extract_strided_slice %54 {offsets = [0, 12], sizes = [16, 256], strides = [1, 1]} : vector<16x278xbf16> to vector<16x256xbf16>
    %60 = vector.extract_strided_slice %54 {offsets = [0, 20], sizes = [16, 256], strides = [1, 1]} : vector<16x278xbf16> to vector<16x256xbf16>
    %61 = vector.extract_strided_slice %54 {offsets = [0, 21], sizes = [16, 256], strides = [1, 1]} : vector<16x278xbf16> to vector<16x256xbf16>
    %62 = vector.extract_strided_slice %54 {offsets = [0, 22], sizes = [16, 256], strides = [1, 1]} : vector<16x278xbf16> to vector<16x256xbf16>
    %63 = tpu.concatenate %55, %56, %57, %58, %52, %59, %60, %61, %62 in 0 : vector<16x256xbf16>, vector<16x256xbf16>, vector<16x256xbf16>, vector<16x256xbf16>, vector<16x256xbf16>, vector<16x256xbf16>, vector<16x256xbf16>, vector<16x256xbf16>, vector<16x256xbf16> -> vector<144x256xbf16>
    %c2 = arith.constant 2 : index
    %c0_22 = arith.constant 0 : index
    %c0_23 = arith.constant 0 : index
    %64 = vector.load %arg2[%c2, %c0_22, %c0_23] : memref<7x16x144xbf16, #tpu.memory_space<vmem>>, vector<1x16x144xbf16>
    %65 = vector.shape_cast %64 : vector<1x16x144xbf16> to vector<16x144xbf16>
    %cst_24 = arith.constant dense<0.000000e+00> : vector<16x256xf32>
    %66 = tpu.matmul %65, %63, %cst_24 {dimension_numbers = #tpu.dot_dimension_numbers<[1], [0], [0], [1], [0, 0, 1, 1], [], []>} : vector<16x144xbf16>, vector<144x256xbf16>, vector<16x256xf32> -> vector<16x256xf32>
    %c2_25 = arith.constant 2 : index
    %c0_26 = arith.constant 0 : index
    %c0_27 = arith.constant 0 : index
    %67 = vector.load %arg3[%c2_25, %c0_26, %c0_27] : memref<7x16x1xf32, #tpu.memory_space<vmem>>, vector<1x16x1xf32>
    %68 = vector.shape_cast %67 : vector<1x16x1xf32> to vector<16x1xf32>
    %69 = vector.broadcast %68 : vector<16x1xf32> to vector<16x256xf32>
    %70 = arith.addf %66, %69 : vector<16x256xf32>
    %71 = vector.broadcast %2 : vector<1x256xf32> to vector<16x256xf32>
    %72 = arith.mulf %70, %71 : vector<16x256xf32>
    %73 = arith.addf %28, %72 : vector<16x256xf32>
    %74 = arith.truncf %73 : vector<16x256xf32> to vector<16x256xbf16>
    %cst_28 = arith.constant 0.000000e+00 : bf16
    %75 = vector.broadcast %cst_28 : bf16 to vector<16x11xbf16>
    %76 = tpu.concatenate %75, %74, %75 in 1 : vector<16x11xbf16>, vector<16x256xbf16>, vector<16x11xbf16> -> vector<16x278xbf16>
    %77 = vector.extract_strided_slice %76 {offsets = [0, 0], sizes = [16, 256], strides = [1, 1]} : vector<16x278xbf16> to vector<16x256xbf16>
    %78 = vector.extract_strided_slice %76 {offsets = [0, 1], sizes = [16, 256], strides = [1, 1]} : vector<16x278xbf16> to vector<16x256xbf16>
    %79 = vector.extract_strided_slice %76 {offsets = [0, 2], sizes = [16, 256], strides = [1, 1]} : vector<16x278xbf16> to vector<16x256xbf16>
    %80 = vector.extract_strided_slice %76 {offsets = [0, 10], sizes = [16, 256], strides = [1, 1]} : vector<16x278xbf16> to vector<16x256xbf16>
    %81 = vector.extract_strided_slice %76 {offsets = [0, 12], sizes = [16, 256], strides = [1, 1]} : vector<16x278xbf16> to vector<16x256xbf16>
    %82 = vector.extract_strided_slice %76 {offsets = [0, 20], sizes = [16, 256], strides = [1, 1]} : vector<16x278xbf16> to vector<16x256xbf16>
    %83 = vector.extract_strided_slice %76 {offsets = [0, 21], sizes = [16, 256], strides = [1, 1]} : vector<16x278xbf16> to vector<16x256xbf16>
    %84 = vector.extract_strided_slice %76 {offsets = [0, 22], sizes = [16, 256], strides = [1, 1]} : vector<16x278xbf16> to vector<16x256xbf16>
    %85 = tpu.concatenate %77, %78, %79, %80, %74, %81, %82, %83, %84 in 0 : vector<16x256xbf16>, vector<16x256xbf16>, vector<16x256xbf16>, vector<16x256xbf16>, vector<16x256xbf16>, vector<16x256xbf16>, vector<16x256xbf16>, vector<16x256xbf16>, vector<16x256xbf16> -> vector<144x256xbf16>
    %c3 = arith.constant 3 : index
    %c0_29 = arith.constant 0 : index
    %c0_30 = arith.constant 0 : index
    %86 = vector.load %arg2[%c3, %c0_29, %c0_30] : memref<7x16x144xbf16, #tpu.memory_space<vmem>>, vector<1x16x144xbf16>
    %87 = vector.shape_cast %86 : vector<1x16x144xbf16> to vector<16x144xbf16>
    %cst_31 = arith.constant dense<0.000000e+00> : vector<16x256xf32>
    %88 = tpu.matmul %87, %85, %cst_31 {dimension_numbers = #tpu.dot_dimension_numbers<[1], [0], [0], [1], [0, 0, 1, 1], [], []>} : vector<16x144xbf16>, vector<144x256xbf16>, vector<16x256xf32> -> vector<16x256xf32>
    %c3_32 = arith.constant 3 : index
    %c0_33 = arith.constant 0 : index
    %c0_34 = arith.constant 0 : index
    %89 = vector.load %arg3[%c3_32, %c0_33, %c0_34] : memref<7x16x1xf32, #tpu.memory_space<vmem>>, vector<1x16x1xf32>
    %90 = vector.shape_cast %89 : vector<1x16x1xf32> to vector<16x1xf32>
    %91 = vector.broadcast %90 : vector<16x1xf32> to vector<16x256xf32>
    %92 = arith.addf %88, %91 : vector<16x256xf32>
    %cst_35 = arith.constant 0.000000e+00 : f32
    %93 = vector.broadcast %cst_35 : f32 to vector<16x256xf32>
    %94 = arith.maximumf %92, %93 : vector<16x256xf32>
    %95 = vector.broadcast %2 : vector<1x256xf32> to vector<16x256xf32>
    %96 = arith.mulf %94, %95 : vector<16x256xf32>
    %97 = arith.truncf %96 : vector<16x256xf32> to vector<16x256xbf16>
    %cst_36 = arith.constant 0.000000e+00 : bf16
    %98 = vector.broadcast %cst_36 : bf16 to vector<16x11xbf16>
    %99 = tpu.concatenate %98, %97, %98 in 1 : vector<16x11xbf16>, vector<16x256xbf16>, vector<16x11xbf16> -> vector<16x278xbf16>
    %100 = vector.extract_strided_slice %99 {offsets = [0, 0], sizes = [16, 256], strides = [1, 1]} : vector<16x278xbf16> to vector<16x256xbf16>
    %101 = vector.extract_strided_slice %99 {offsets = [0, 1], sizes = [16, 256], strides = [1, 1]} : vector<16x278xbf16> to vector<16x256xbf16>
    %102 = vector.extract_strided_slice %99 {offsets = [0, 2], sizes = [16, 256], strides = [1, 1]} : vector<16x278xbf16> to vector<16x256xbf16>
    %103 = vector.extract_strided_slice %99 {offsets = [0, 10], sizes = [16, 256], strides = [1, 1]} : vector<16x278xbf16> to vector<16x256xbf16>
    %104 = vector.extract_strided_slice %99 {offsets = [0, 12], sizes = [16, 256], strides = [1, 1]} : vector<16x278xbf16> to vector<16x256xbf16>
    %105 = vector.extract_strided_slice %99 {offsets = [0, 20], sizes = [16, 256], strides = [1, 1]} : vector<16x278xbf16> to vector<16x256xbf16>
    %106 = vector.extract_strided_slice %99 {offsets = [0, 21], sizes = [16, 256], strides = [1, 1]} : vector<16x278xbf16> to vector<16x256xbf16>
    %107 = vector.extract_strided_slice %99 {offsets = [0, 22], sizes = [16, 256], strides = [1, 1]} : vector<16x278xbf16> to vector<16x256xbf16>
    %108 = tpu.concatenate %100, %101, %102, %103, %97, %104, %105, %106, %107 in 0 : vector<16x256xbf16>, vector<16x256xbf16>, vector<16x256xbf16>, vector<16x256xbf16>, vector<16x256xbf16>, vector<16x256xbf16>, vector<16x256xbf16>, vector<16x256xbf16>, vector<16x256xbf16> -> vector<144x256xbf16>
    %c4 = arith.constant 4 : index
    %c0_37 = arith.constant 0 : index
    %c0_38 = arith.constant 0 : index
    %109 = vector.load %arg2[%c4, %c0_37, %c0_38] : memref<7x16x144xbf16, #tpu.memory_space<vmem>>, vector<1x16x144xbf16>
    %110 = vector.shape_cast %109 : vector<1x16x144xbf16> to vector<16x144xbf16>
    %cst_39 = arith.constant dense<0.000000e+00> : vector<16x256xf32>
    %111 = tpu.matmul %110, %108, %cst_39 {dimension_numbers = #tpu.dot_dimension_numbers<[1], [0], [0], [1], [0, 0, 1, 1], [], []>} : vector<16x144xbf16>, vector<144x256xbf16>, vector<16x256xf32> -> vector<16x256xf32>
    %c4_40 = arith.constant 4 : index
    %c0_41 = arith.constant 0 : index
    %c0_42 = arith.constant 0 : index
    %112 = vector.load %arg3[%c4_40, %c0_41, %c0_42] : memref<7x16x1xf32, #tpu.memory_space<vmem>>, vector<1x16x1xf32>
    %113 = vector.shape_cast %112 : vector<1x16x1xf32> to vector<16x1xf32>
    %114 = vector.broadcast %113 : vector<16x1xf32> to vector<16x256xf32>
    %115 = arith.addf %111, %114 : vector<16x256xf32>
    %116 = vector.broadcast %2 : vector<1x256xf32> to vector<16x256xf32>
    %117 = arith.mulf %115, %116 : vector<16x256xf32>
    %118 = arith.addf %73, %117 : vector<16x256xf32>
    %119 = arith.truncf %118 : vector<16x256xf32> to vector<16x256xbf16>
    %cst_43 = arith.constant 0.000000e+00 : bf16
    %120 = vector.broadcast %cst_43 : bf16 to vector<16x11xbf16>
    %121 = tpu.concatenate %120, %119, %120 in 1 : vector<16x11xbf16>, vector<16x256xbf16>, vector<16x11xbf16> -> vector<16x278xbf16>
    %122 = vector.extract_strided_slice %121 {offsets = [0, 0], sizes = [16, 256], strides = [1, 1]} : vector<16x278xbf16> to vector<16x256xbf16>
    %123 = vector.extract_strided_slice %121 {offsets = [0, 1], sizes = [16, 256], strides = [1, 1]} : vector<16x278xbf16> to vector<16x256xbf16>
    %124 = vector.extract_strided_slice %121 {offsets = [0, 2], sizes = [16, 256], strides = [1, 1]} : vector<16x278xbf16> to vector<16x256xbf16>
    %125 = vector.extract_strided_slice %121 {offsets = [0, 10], sizes = [16, 256], strides = [1, 1]} : vector<16x278xbf16> to vector<16x256xbf16>
    %126 = vector.extract_strided_slice %121 {offsets = [0, 12], sizes = [16, 256], strides = [1, 1]} : vector<16x278xbf16> to vector<16x256xbf16>
    %127 = vector.extract_strided_slice %121 {offsets = [0, 20], sizes = [16, 256], strides = [1, 1]} : vector<16x278xbf16> to vector<16x256xbf16>
    %128 = vector.extract_strided_slice %121 {offsets = [0, 21], sizes = [16, 256], strides = [1, 1]} : vector<16x278xbf16> to vector<16x256xbf16>
    %129 = vector.extract_strided_slice %121 {offsets = [0, 22], sizes = [16, 256], strides = [1, 1]} : vector<16x278xbf16> to vector<16x256xbf16>
    %130 = tpu.concatenate %122, %123, %124, %125, %119, %126, %127, %128, %129 in 0 : vector<16x256xbf16>, vector<16x256xbf16>, vector<16x256xbf16>, vector<16x256xbf16>, vector<16x256xbf16>, vector<16x256xbf16>, vector<16x256xbf16>, vector<16x256xbf16>, vector<16x256xbf16> -> vector<144x256xbf16>
    %c5 = arith.constant 5 : index
    %c0_44 = arith.constant 0 : index
    %c0_45 = arith.constant 0 : index
    %131 = vector.load %arg2[%c5, %c0_44, %c0_45] : memref<7x16x144xbf16, #tpu.memory_space<vmem>>, vector<1x16x144xbf16>
    %132 = vector.shape_cast %131 : vector<1x16x144xbf16> to vector<16x144xbf16>
    %cst_46 = arith.constant dense<0.000000e+00> : vector<16x256xf32>
    %133 = tpu.matmul %132, %130, %cst_46 {dimension_numbers = #tpu.dot_dimension_numbers<[1], [0], [0], [1], [0, 0, 1, 1], [], []>} : vector<16x144xbf16>, vector<144x256xbf16>, vector<16x256xf32> -> vector<16x256xf32>
    %c5_47 = arith.constant 5 : index
    %c0_48 = arith.constant 0 : index
    %c0_49 = arith.constant 0 : index
    %134 = vector.load %arg3[%c5_47, %c0_48, %c0_49] : memref<7x16x1xf32, #tpu.memory_space<vmem>>, vector<1x16x1xf32>
    %135 = vector.shape_cast %134 : vector<1x16x1xf32> to vector<16x1xf32>
    %136 = vector.broadcast %135 : vector<16x1xf32> to vector<16x256xf32>
    %137 = arith.addf %133, %136 : vector<16x256xf32>
    %138 = vector.broadcast %2 : vector<1x256xf32> to vector<16x256xf32>
    %139 = arith.mulf %137, %138 : vector<16x256xf32>
    %140 = arith.truncf %139 : vector<16x256xf32> to vector<16x256xbf16>
    %cst_50 = arith.constant 0.000000e+00 : bf16
    %141 = vector.broadcast %cst_50 : bf16 to vector<16x11xbf16>
    %142 = tpu.concatenate %141, %140, %141 in 1 : vector<16x11xbf16>, vector<16x256xbf16>, vector<16x11xbf16> -> vector<16x278xbf16>
    %143 = vector.extract_strided_slice %142 {offsets = [0, 0], sizes = [16, 256], strides = [1, 1]} : vector<16x278xbf16> to vector<16x256xbf16>
    %144 = vector.extract_strided_slice %142 {offsets = [0, 1], sizes = [16, 256], strides = [1, 1]} : vector<16x278xbf16> to vector<16x256xbf16>
    %145 = vector.extract_strided_slice %142 {offsets = [0, 2], sizes = [16, 256], strides = [1, 1]} : vector<16x278xbf16> to vector<16x256xbf16>
    %146 = vector.extract_strided_slice %142 {offsets = [0, 10], sizes = [16, 256], strides = [1, 1]} : vector<16x278xbf16> to vector<16x256xbf16>
    %147 = vector.extract_strided_slice %142 {offsets = [0, 12], sizes = [16, 256], strides = [1, 1]} : vector<16x278xbf16> to vector<16x256xbf16>
    %148 = vector.extract_strided_slice %142 {offsets = [0, 20], sizes = [16, 256], strides = [1, 1]} : vector<16x278xbf16> to vector<16x256xbf16>
    %149 = vector.extract_strided_slice %142 {offsets = [0, 21], sizes = [16, 256], strides = [1, 1]} : vector<16x278xbf16> to vector<16x256xbf16>
    %150 = vector.extract_strided_slice %142 {offsets = [0, 22], sizes = [16, 256], strides = [1, 1]} : vector<16x278xbf16> to vector<16x256xbf16>
    %151 = tpu.concatenate %143, %144, %145, %146, %140, %147, %148, %149, %150 in 0 : vector<16x256xbf16>, vector<16x256xbf16>, vector<16x256xbf16>, vector<16x256xbf16>, vector<16x256xbf16>, vector<16x256xbf16>, vector<16x256xbf16>, vector<16x256xbf16>, vector<16x256xbf16> -> vector<144x256xbf16>
    %c6 = arith.constant 6 : index
    %c0_51 = arith.constant 0 : index
    %c0_52 = arith.constant 0 : index
    %152 = vector.load %arg2[%c6, %c0_51, %c0_52] : memref<7x16x144xbf16, #tpu.memory_space<vmem>>, vector<1x16x144xbf16>
    %153 = vector.shape_cast %152 : vector<1x16x144xbf16> to vector<16x144xbf16>
    %cst_53 = arith.constant dense<0.000000e+00> : vector<16x256xf32>
    %154 = tpu.matmul %153, %151, %cst_53 {dimension_numbers = #tpu.dot_dimension_numbers<[1], [0], [0], [1], [0, 0, 1, 1], [], []>} : vector<16x144xbf16>, vector<144x256xbf16>, vector<16x256xf32> -> vector<16x256xf32>
    %c6_54 = arith.constant 6 : index
    %c0_55 = arith.constant 0 : index
    %c0_56 = arith.constant 0 : index
    %155 = vector.load %arg3[%c6_54, %c0_55, %c0_56] : memref<7x16x1xf32, #tpu.memory_space<vmem>>, vector<1x16x1xf32>
    %156 = vector.shape_cast %155 : vector<1x16x1xf32> to vector<16x1xf32>
    %157 = vector.broadcast %156 : vector<16x1xf32> to vector<16x256xf32>
    %158 = arith.addf %154, %157 : vector<16x256xf32>
    %159 = arith.addf %158, %1 : vector<16x256xf32>
    %c0_57 = arith.constant 0 : index
    %c0_58 = arith.constant 0 : index
    %c0_59 = arith.constant 0 : index
    %160 = vector.load %arg6[%c0_57, %c0_58, %c0_59] : memref<1x16x256xf32, #tpu.memory_space<vmem>>, vector<1x16x256xf32>
    %161 = vector.shape_cast %160 : vector<1x16x256xf32> to vector<16x256xf32>
    %162 = vector.shape_cast %159 : vector<16x256xf32> to vector<1x16x256xf32>
    tpu.vector_store %arg6[%c0_57, %c0_58, %c0_59], %162 {strides = array<i32>} : memref<1x16x256xf32, #tpu.memory_space<vmem>>, vector<1x16x256xf32>,
    return
  }
  func.func @transform_0(%arg0: i32) -> (i32, i32, i32) {
    %c0_i32 = arith.constant 0 : i32
    %c0_i32_0 = arith.constant 0 : i32
    %c0_i32_1 = arith.constant 0 : i32
    return %arg0, %c0_i32, %c0_i32_0 : i32, i32, i32
  }
  func.func @transform_1(%arg0: i32) -> (i32, i32, i32) {
    %c0_i32 = arith.constant 0 : i32
    %c0_i32_0 = arith.constant 0 : i32
    %c0_i32_1 = arith.constant 0 : i32
    %c0_i32_2 = arith.constant 0 : i32
    return %c0_i32, %c0_i32_0, %c0_i32_1 : i32, i32, i32
  }
  func.func @transform_2(%arg0: i32) -> (i32, i32, i32) {
    %c0_i32 = arith.constant 0 : i32
    %c0_i32_0 = arith.constant 0 : i32
    %c0_i32_1 = arith.constant 0 : i32
    %c0_i32_2 = arith.constant 0 : i32
    return %c0_i32, %c0_i32_0, %c0_i32_1 : i32, i32, i32
  }
  func.func @transform_3(%arg0: i32) -> (i32, i32) {
    %c0_i32 = arith.constant 0 : i32
    %c0_i32_0 = arith.constant 0 : i32
    %c0_i32_1 = arith.constant 0 : i32
    return %c0_i32, %c0_i32_0 : i32, i32
  }
  func.func @transform_4(%arg0: i32) -> (i32, i32) {
    %c0_i32 = arith.constant 0 : i32
    %c0_i32_0 = arith.constant 0 : i32
    %c0_i32_1 = arith.constant 0 : i32
    return %c0_i32, %c0_i32_0 : i32, i32
  }
  func.func @transform_5(%arg0: i32) -> (i32, i32, i32) {
    %c0_i32 = arith.constant 0 : i32
    %c0_i32_0 = arith.constant 0 : i32
    %c0_i32_1 = arith.constant 0 : i32
    return %arg0, %c0_i32, %c0_i32_0 : i32, i32, i32
  }
}

</mosaic_0001>

<bundles_post_ra>
// kernel: tile.13
= control target key start
LH: loop header
LB: loop body
LE: loop exit
PB: predicated region body
PF: predicated region fallthrough
CT: control target
= control target key end

     0   :  { %s83_s10 = smov 90   ;;  %s84_s11 = smov 70   ;;  %vm3_vm0 = vcmask 80896   ;;  %vm9_vm1 = vcmask 818896   ;;  %vm15_vm2 = vcmask 736896   ;;  %vm21_vm3 = vcmask 654896   ;;  %s135_s0 = inlined_call_operand.vmem [shape: f32[10,10], index: 0, kind: input, shape index: {}]   ;;  %s136_s1 = inlined_call_operand.vmem [shape: f32[100], index: 1, kind: output, shape index: {}]  }
   0x1   :  { %v65_v0 = vld [vmem:[%s135_s0 + $0x9] sm:$0x1]   ;;  %v67_v1 = vld [vmem:[%s135_s0 + $0x7] sm:$0x1]   ;;  %v69_v2 = vld [vmem:[%s135_s0 + $0x5] sm:$0x1]  }
   0x2   :  { %7 = vrot.lane.b32.xlu0 %v65_v0, %s83_s10  ;;  %19 = vrot.lane.b32.xlu1 %v67_v1, %s84_s11  ;;  %s85_s14 = smov 50   ;;  %v66_v3 = vld [vmem:[%s135_s0 + $0x8] sm:$0x1]   ;;  %v68_v4 = vld [vmem:[%s135_s0 + $0x6] sm:$0x1]   ;;  %s86_s19 = smov 80  }
   0x3   :  { %31 = vrot.lane.b32.xlu2 %v69_v2, %s85_s14  ;;  %s87_s20 = smov 60   ;;  %v70_v5 = vld [vmem:[%s135_s0 + $0x4] sm:$0x1]   ;;  %s88_s23 = smov 40   ;;  %v71_v6 = vld [vmem:[%s135_s0 + $0x3] sm:$0x1]  }
   0x4   :  { %v72_v7 = vld [vmem:[%s135_s0 + $0x2] sm:$0x1]   ;;  %s89_s28 = smov 30   ;;  %s90_s29 = smov 20   ;;  %v73_v8 = vld [vmem:[%s135_s0 + $0x1] sm:$0x1]  }
   0x5   :  { %s91_s3 = smov 10   ;;  %v2_v9 = vld [vmem:[%s135_s0] sm:$0x1]   ;;  %vm27_vm4 = vcmask 572896   ;;  %vm33_vm5 = vcmask 490896   ;;  %vm39_vm6 = vcmask 408896  }
   0x6   :  { %4 = vst.msk [vmem:[#allocation0] sm:$0x1] %vm3_vm0, %v2_v9   ;;  %vm45_vm7 = vcmask 326896   ;;  %vm51_vm8 = vcmask 244896   ;;  %vm57_vm9 = vcmask 162896  }
   0xa   :  { %13 = vrot.lane.b32.xlu0 %v66_v3, %s86_s19  ;;  %25 = vrot.lane.b32.xlu1 %v68_v4, %s87_s20 }
   0xb   :  { %37 = vrot.lane.b32.xlu2 %v70_v5, %s88_s23 }
  0x12   :  { %43 = vrot.lane.b32.xlu0 %v71_v6, %s89_s28  ;;  %49 = vrot.lane.b32.xlu1 %v72_v7, %s90_s29 }
  0x13   :  { %55 = vrot.lane.b32.xlu2 %v73_v8, %s91_s3 }
  0x5d   :  { %v32_v10 = vpop.permute.xlu2 %31  }
  0x65   :  { %v38_v11 = vpop.permute.xlu2 %37  }
  0x6d   :  { %v56_v12 = vpop.permute.xlu2 %55  }
  0x74   :  { %v8_v13 = vpop.permute.xlu0 %7   ;;  %v20_v14 = vpop.permute.xlu1 %19  }
  0x75   :  { %10 = vst.msk [vmem:[#allocation0] sm:$0x1] %vm9_vm1, %v8_v13  }
  0x7c   :  { %v14_v15 = vpop.permute.xlu0 %13   ;;  %v26_v16 = vpop.permute.xlu1 %25  }
  0x7d   :  { %16 = vst.msk [vmem:[#allocation0] sm:$0x1] %vm15_vm2, %v14_v15  }
  0x7e   :  { %22 = vst.msk [vmem:[#allocation0] sm:$0x1] %vm21_vm3, %v20_v14  }
  0x7f   :  { %28 = vst.msk [vmem:[#allocation0] sm:$0x1] %vm27_vm4, %v26_v16  }
  0x80   :  { %34 = vst.msk [vmem:[#allocation0] sm:$0x1] %vm33_vm5, %v32_v10  }
  0x81   :  { %40 = vst.msk [vmem:[#allocation0] sm:$0x1] %vm39_vm6, %v38_v11  }
  0x84   :  { %v44_v17 = vpop.permute.xlu0 %43   ;;  %v50_v18 = vpop.permute.xlu1 %49  }
  0x85   :  { %46 = vst.msk [vmem:[#allocation0] sm:$0x1] %vm45_vm7, %v44_v17  }
  0x86   :  { %52 = vst.msk [vmem:[#allocation0] sm:$0x1] %vm51_vm8, %v50_v18  }
  0x87   :  { %58 = vst.msk [vmem:[#allocation0] sm:$0x1] %vm57_vm9, %v56_v12  }
  0x8e   :  { %v61_v19 = vld [vmem:[#allocation0] sm:$0x1] }
  0x8f   :  { %64 = vst [vmem:[%s136_s1] sm:$0x1] %v61_v19 }

// kernel: tile.14
= control target key start
LH: loop header
LB: loop body
LE: loop exit
PB: predicated region body
PF: predicated region fallthrough
CT: control target
= control target key end

     0   :  { %s22_s0 = inlined_call_operand.vmem [shape: f32[100], index: 0, kind: input, shape index: {}]   ;;  %s23_s1 = inlined_call_operand.vmem [shape: f32[2,100], index: 1, kind: output, shape index: {}]  }
   0x1   :  { %v4_v0 = vld [vmem:[%s22_s0] ss:$0 sm:$0xff] }
   0x2   :  { %5 = vst [vmem:[%s23_s1] sm:$0x3] %v4_v0 }

// kernel: tile.15
= control target key start
LH: loop header
LB: loop body
LE: loop exit
PB: predicated region body
PF: predicated region fallthrough
CT: control target
= control target key end

     0   :  { %vm13_vm0 = vcmask 228352   ;;  %vm7_vm1 = vcmask 818176   ;;  %vm17_vm2 = vcmask 588800   ;;  %vm20_vm3 = vcmask 1048352   ;;  %s46_s0 = inlined_call_operand.vmem [shape: f32[2,100], index: 0, kind: input, shape index: {}]   ;;  %s47_s1 = inlined_call_operand.vmem [shape: f32[200], index: 1, kind: output, shape index: {}]  }
   0x1   :  { %v4_v0 = vld [vmem:[%s46_s0] sm:$0x3]  ;;  %s29_s0 = smov 100  }
   0x2   :  { %5 = vst [vmem:[#allocation1] sm:$0x3] %v4_v0 }
   0x9   :  { %v10_v1 = vld [vmem:[#allocation1 + $0x1] sm:$0x1]   ;;  %v6_v3 = vld [vmem:[#allocation1] sm:$0x1]  }
   0xa   :  { %v12_v2 = vld [vmem:[#allocation1 + $0x1] sm:$0x1]   ;;  %8 = vst.msk [vmem:[#allocation0] sm:$0x1] %vm7_vm1, %v6_v3  }
   0xb   :  { %v14_v4 = vsel %vm13_vm0, %v12_v2, %v10_v1 }
   0xc   :  { %15 = vrot.lane.b32.xlu0 %v14_v4, %s29_s0 }
  0x7e   :  { %v16_v5 = vpop.permute.xlu0 %15  }
  0x7f   :  { %19 = vst.msk [vmem:[#allocation0 + $0x1] sm:$0x1] %vm17_vm2, %v16_v5  }
  0x80   :  { %21 = vst.msk [vmem:[#allocation0] sm:$0x1] %vm20_vm3, %v16_v5  }
  0x87   :  { %v24_v6 = vld [vmem:[#allocation0] sm:$0x3] }
  0x88   :  { %27 = vst [vmem:[%s47_s1] sm:$0x3] %v24_v6 }

// kernel: tile.10
= control target key start
LH: loop header
LB: loop body
LE: loop exit
PB: predicated region body
PF: predicated region fallthrough
CT: control target
= control target key end

     0   :  { %s22_s0 = inlined_call_operand.vmem [shape: f32[3], index: 0, kind: input, shape index: {}]   ;;  %s23_s1 = inlined_call_operand.vmem [shape: f32[4,3], index: 1, kind: output, shape index: {}]  }
   0x1   :  { %v4_v0 = vld [vmem:[%s22_s0] ss:$0 sm:$0xff] }
   0x2   :  { %5 = vst [vmem:[%s23_s1] sm:$0xf] %v4_v0 }

// kernel: tile.11
= control target key start
LH: loop header
LB: loop body
LE: loop exit
PB: predicated region body
PF: predicated region fallthrough
CT: control target
= control target key end

     0   :  { %s37_s8 = smov 3   ;;  %s38_s9 = smov 6   ;;  %vm7_vm0 = vcmask 23552   ;;  %vm13_vm1 = vcmask 97352   ;;  %vm19_vm2 = vcmask 72752   ;;  %vm25_vm3 = vcmask 48152   ;;  %s55_s0 = inlined_call_operand.vmem [shape: f32[4,3], index: 0, kind: input, shape index: {}]   ;;  %s56_s1 = inlined_call_operand.vmem [shape: f32[12], index: 1, kind: output, shape index: {}]  }
   0x1   :  { %v4_v0 = vld [vmem:[%s55_s0] sm:$0xf]  ;;  %s36_s0 = smov 9  }
   0x2   :  { %5 = vst [vmem:[#allocation1] sm:$0xf] %v4_v0 }
   0x9   :  { %v10_v1 = vld [vmem:[#allocation1 + $0x3] sm:$0x1]   ;;  %v22_v2 = vld [vmem:[#allocation1 + $0x1] sm:$0x1]   ;;  %v16_v3 = vld [vmem:[#allocation1 + $0x2] sm:$0x1]  }
   0xa   :  { %11 = vrot.lane.b32.xlu0 %v10_v1, %s36_s0  ;;  %23 = vrot.lane.b32.xlu1 %v22_v2, %s37_s8  ;;  %v6_v4 = vld [vmem:[#allocation1] sm:$0x1]  }
   0xb   :  { %8 = vst.msk [vmem:[#allocation0] sm:$0x1] %vm7_vm0, %v6_v4  }
  0x12   :  { %17 = vrot.lane.b32.xlu0 %v16_v3, %s38_s9 }
  0x7c   :  { %v12_v5 = vpop.permute.xlu0 %11   ;;  %v24_v6 = vpop.permute.xlu1 %23  }
  0x7d   :  { %14 = vst.msk [vmem:[#allocation0] sm:$0x1] %vm13_vm1, %v12_v5  }
  0x84   :  { %v18_v7 = vpop.permute.xlu0 %17  }
  0x85   :  { %20 = vst.msk [vmem:[#allocation0] sm:$0x1] %vm19_vm2, %v18_v7  }
  0x86   :  { %26 = vst.msk [vmem:[#allocation0] sm:$0x1] %vm25_vm3, %v24_v6  }
  0x8d   :  { %v29_v8 = vld [vmem:[#allocation0] sm:$0x1] }
  0x8e   :  { %32 = vst [vmem:[%s56_s1] sm:$0x1] %v29_v8 }

// kernel: feqe_forward.1
= control target key start
LH: loop header
LB: loop body
LE: loop exit
PB: predicated region body
PF: predicated region fallthrough
CT: control target
= control target key end

     0   :  { %v1503_v0 = vmov 0   ;;  %s1504_s30 = smov 11   ;;  %vm65_vm0 = vcmask 89088   ;;  %s1505_s6 = smov 108   ;;  %vm140_vm1 = vcmask 875520   ;;  %vm129_vm2 = vcmask 883712   ;;  %s2211_s3 = inlined_call_operand.vmem [shape: f32[16,1], index: 3, kind: input, shape index: {}]   ;;  %s2212_s4 = inlined_call_operand.vmem [shape: f32[1,256], index: 4, kind: input, shape index: {}]   ;;  %s2213_s0 = inlined_call_operand.vmem [shape: f32[1,16,256], index: 0, kind: input, shape index: {}]   ;;  %s2214_s2 = inlined_call_operand.vmem [shape: f32[7,16,1], index: 2, kind: input, shape index: {}]   ;;  %s2215_s1 = inlined_call_operand.vmem [shape: bf16[7,16,144], index: 1, kind: input, shape index: {}]   ;;  %s2216_s5 = inlined_call_operand.vmem [shape: f32[1,16,256], index: 5, kind: output, shape index: {}]  }
   0x1   :  { %1496 = vset.pattern.permute.xlu0 %v1503_v0  ;;  %v26_v1 = vld [vmem:[%s2211_s3] sm:$0xff]  ;;  %1497 = vset.pattern.permute.xlu1 %v1503_v0  ;;  %v27_v2 = vld [vmem:[%s2211_s3 + $0x8] sm:$0xff]  ;;  %v23_v11 = vld [vmem:[%s2213_s0 + $0x10] sm:$0xff]  ;;  %s1506_s7 = smov 107   ;;  %s1507_s8 = smov 116   ;;  %vm118_vm3 = vcmask 949248  }
   0x2   :  { %30 = vperm.xlu0 %1496, %v26_v1   ;;  %1498 = vset.pattern.permute.xlu2 %v1503_v0  ;;  %v25_v3 = vld [vmem:[%s2212_s4] sm:$0x3]  ;;  %v22_v6 = vld [vmem:[%s2213_s0 + $0x8] sm:$0xff]  ;;  %v24_v12 = vld [vmem:[%s2213_s0 + $0x18] sm:$0xff]  ;;  %s1508_s9 = smov 118   ;;  %s1509_s10 = smov 126  }
   0x3   :  { %v21_v5 = vld [vmem:[%s2213_s0] sm:$0xff]  ;;  %v1557_v7 = vperm.slane %v25_v3, 0  ;;  %v1559_v8 = vperm.slane %v25_v3, 1  ;;  %s1510_s11 = smov 127   ;;  %s1511_s12 = smov 106   ;;  %vm105_vm4 = vcmask 965632   ;;  %vm1647_vm9 = vmneg %vm65_vm0 }
   0x4   :  { %v158_v52 = vld [vmem:[%s2214_s2] sm:$0xff]  ;;  %v159_v53 = vld [vmem:[%s2214_s2 + $0x8] sm:$0xff]  ;;  %vm94_vm5 = vcmask 1031168   ;;  %vm83_vm6 = vcmask 1039360   ;;  %vm151_vm7 = vcmask 867328   ;;  %vm179_vm8 = vcmask 130048  }
   0x5   :  { %v1367_v63 = vld [vmem:[%s2215_s1] sm:$0xf]  ;;  %v1474_v0 = vld [vmem:[%s2215_s1 + $0x4] sm:$0xf0]  ;;  %v1369_v3 = vld [vmem:[%s2215_s1 + $0x8] sm:$0xf0] }
   0x6   :  { %v1368_v1 = vor.u32 %v1474_v0, %v1367_v63  ;;  %v1385_v63 = vld [vmem:[%s2215_s1 + $0x18] sm:$0xf0] }
   0xa   :  { %35 = vperm.xlu0 %1496, %v27_v2   ;;  %v1473_v2 = vld [vmem:[%s2215_s1 + $0x4] sm:$0xf] }
  0x74   :  { %v31_v4 = vpop.permute.xlu0 %30 }
  0x75   :  { %v38_v9 = vsub.f32 %v21_v5, %v31_v4  ;;  %v39_v10 = vsub.f32 %v22_v6, %v31_v4 }
  0x77   :  { %v47_v13 = vmul.f32 %v1557_v7, %v38_v9  ;;  %v48_v14 = vmul.f32 %v1559_v8, %v39_v10 }
  0x79   :  { %v51_v20 = vpack.c.bf16 %v48_v14, %v47_v13 }
  0x7b   :  { %v55_v22 = vunpack.c.l.b16 %v51_v20  ;;  %v56_v26 = vunpack.c.h.b16 %v51_v20 }
  0x7c   :  { %v36_v15 = vpop.permute.xlu0 %35 }
  0x7d   :  { %v40_v16 = vsub.f32 %v23_v11, %v36_v15  ;;  %v41_v17 = vsub.f32 %v24_v12, %v36_v15  ;;  %v1372_v11 = vor.u32 %v1473_v2, %v1369_v3  ;;  %v1499_v12 = vld [vmem:[%s2213_s0 + $0x8] sm:$0xff] }
  0x7f   :  { %v49_v18 = vmul.f32 %v1557_v7, %v40_v16  ;;  %v50_v19 = vmul.f32 %v1559_v8, %v41_v17 }
  0x81   :  { %v52_v21 = vpack.c.bf16 %v50_v19, %v49_v18 }
  0x83   :  { %v57_v23 = vunpack.c.l.b16 %v52_v21  ;;  %v58_v25 = vunpack.c.h.b16 %v52_v21 }
  0x85   :  { %v1571_v24 = vpack.c.b16 %v57_v23, %v55_v22  ;;  %v60_v27 = vpack.c.b16 %v58_v25, %v56_v26 }
  0x87   :  { %61 = vrot.lane.b32.xlu1 %v1571_v24, %s1504_s30 }
  0x8f   :  { %63 = vrot.lane.b32.xlu1 %v60_v27, %s1504_s30 }
  0xf9   :  { %v1576_v28 = vpop.permute.xlu1 %61 }
  0xfa   :  { %v71_v32 = vsel %vm65_vm0, 0, %v1576_v28 }
 0x101   :  { %v64_v29 = vpop.permute.xlu1 %63 }
 0x102   :  { %v1580_v30 = vsel %vm65_vm0, %v1576_v28, %v64_v29  ;;  %v74_v31 = vsel %vm65_vm0, %v64_v29, 0 }
 0x103   :  { %127 = vrot.lane.b32.xlu1 %v74_v31, %s1505_s6  ;;  %125 = vrot.lane.b32.xlu0 %v1580_v30, %s1505_s6 }
 0x104   :  { %136 = vrot.lane.b32.xlu2 %v1580_v30, %s1506_s7 }
 0x10b   :  { %116 = vrot.lane.b32.xlu1 %v74_v31, %s1507_s8  ;;  %114 = vrot.lane.b32.xlu0 %v1580_v30, %s1507_s8 }
 0x10c   :  { %138 = vrot.lane.b32.xlu2 %v74_v31, %s1506_s7 }
 0x113   :  { %101 = vrot.lane.b32.xlu1 %v1580_v30, %s1508_s9  ;;  %112 = vrot.lane.b32.xlu0 %v71_v32, %s1507_s8 }
 0x114   :  { %134 = vrot.lane.b32.xlu2 %v71_v32, %s1506_s7 }
 0x11b   :  { %92 = vrot.lane.b32.xlu1 %v74_v31, %s1509_s10  ;;  %90 = vrot.lane.b32.xlu0 %v1580_v30, %s1509_s10 }
 0x11c   :  { %123 = vrot.lane.b32.xlu2 %v71_v32, %s1505_s6 }
 0x123   :  { %81 = vrot.lane.b32.xlu1 %v74_v31, %s1510_s11  ;;  %79 = vrot.lane.b32.xlu0 %v1580_v30, %s1510_s11 }
 0x124   :  { %103 = vrot.lane.b32.xlu2 %v74_v31, %s1508_s9 }
 0x12b   :  { %147 = vrot.lane.b32.xlu1 %v1580_v30, %s1511_s12  ;;  %77 = vrot.lane.b32.xlu0 %v71_v32, %s1510_s11 }
 0x12c   :  { %99 = vrot.lane.b32.xlu2 %v71_v32, %s1508_s9 }
 0x133   :  { %145 = vrot.lane.b32.xlu0 %v71_v32, %s1511_s12  ;;  %162 = vperm.xlu1 %1497, %v158_v52  }
 0x134   :  { %88 = vrot.lane.b32.xlu2 %v71_v32, %s1509_s10 }
 0x13c   :  { %149 = vrot.lane.b32.xlu2 %v74_v31, %s1511_s12 }
 0x144   :  { %167 = vperm.xlu2 %1498, %v159_v53  }
 0x15e   :  { %v137_v33 = vpop.permute.xlu2 %136 }
 0x166   :  { %v139_v34 = vpop.permute.xlu2 %138 }
 0x167   :  { %v142_v35 = vsel %vm140_vm1, %v137_v33, %v139_v34 }
 0x168   :  { %211 = vmatpush.bf16.msra.mxu2 %v142_v35 }
 0x16e   :  { %v135_v36 = vpop.permute.xlu2 %134 }
 0x16f   :  { %v141_v37 = vsel %vm140_vm1, %v135_v36, %v137_v33 }
 0x170   :  { %183 = vmatpush.bf16.msra.mxu0 %v141_v37 }
 0x175   :  { %v128_v38 = vpop.permute.xlu1 %127  ;;  %v126_v39 = vpop.permute.xlu0 %125 }
 0x176   :  { %v124_v40 = vpop.permute.xlu2 %123  ;;  %v131_v41 = vsel %vm129_vm2, %v126_v39, %v128_v38 }
 0x177   :  { %v130_v42 = vsel %vm129_vm2, %v124_v40, %v126_v39  ;;  %212 = vmatpush.bf16.msra.mxu2 %v131_v41 }
 0x178   :  { %184 = vmatpush.bf16.msra.mxu0 %v130_v42 }
 0x17d   :  { %v117_v43 = vpop.permute.xlu1 %116  ;;  %v115_v44 = vpop.permute.xlu0 %114 }
 0x17e   :  { %v104_v45 = vpop.permute.xlu2 %103  ;;  %v120_v46 = vsel %vm118_vm3, %v115_v44, %v117_v43 }
 0x17f   :  { %213 = vmatpush.bf16.msra.mxu2 %v120_v46 }
 0x183   :  { %214 = vmatpush.bf16.msra.mxu2 %v60_v27 }
 0x185   :  { %v102_v47 = vpop.permute.xlu1 %101  ;;  %v113_v48 = vpop.permute.xlu0 %112 }
 0x186   :  { %v100_v49 = vpop.permute.xlu2 %99  ;;  %v119_v50 = vsel %vm118_vm3, %v113_v48, %v115_v44  ;;  %v107_v51 = vsel %vm105_vm4, %v102_v47, %v104_v45 }
 0x187   :  { %185 = vmatpush.bf16.msra.mxu0 %v119_v50  ;;  %215 = vmatpush.bf16.msra.mxu2 %v107_v51  ;;  %v106_v56 = vsel %vm105_vm4, %v100_v49, %v102_v47  ;;  %v1380_v50 = vld [vmem:[%s2214_s2 + $0x18] sm:$0xff]  ;;  %v1379_v51 = vld [vmem:[%s2214_s2 + $0x10] sm:$0xff] }
 0x18b   :  { %186 = vmatpush.bf16.msra.mxu0 %v1571_v24 }
 0x18d   :  { %v93_v54 = vpop.permute.xlu1 %92  ;;  %v91_v55 = vpop.permute.xlu0 %90 }
 0x18e   :  { %v96_v57 = vsel %vm94_vm5, %v91_v55, %v93_v54  ;;  %v89_v58 = vpop.permute.xlu2 %88 }
 0x18f   :  { %187 = vmatpush.bf16.msra.mxu0 %v106_v56  ;;  %216 = vmatpush.bf16.msra.mxu2 %v96_v57  ;;  %v95_v59 = vsel %vm94_vm5, %v89_v58, %v91_v55 }
 0x193   :  { %188 = vmatpush.bf16.msra.mxu0 %v95_v59 }
 0x195   :  { %v82_v60 = vpop.permute.xlu1 %81  ;;  %v80_v61 = vpop.permute.xlu0 %79 }
 0x196   :  { %v85_v62 = vsel %vm83_vm6, %v80_v61, %v82_v60  ;;  %v150_v4 = vpop.permute.xlu2 %149 }
 0x197   :  { %217 = vmatpush.bf16.msra.mxu2 %v85_v62  ;;  %v1475_v62 = vld [vmem:[%s2215_s1 + $0x14] sm:$0xf] }
 0x19b   :  { %218 = vmatpush.bf16.msra.mxu2 %v1580_v30 }
 0x19d   :  { %v148_v5 = vpop.permute.xlu1 %147  ;;  %v78_v6 = vpop.permute.xlu0 %77 }
 0x19e   :  { %219 = vmatmul.bf16.vlgmr.msra.gmra.mxu2 %v1368_v1  ;;  %v84_v9 = vsel %vm83_vm6, %v78_v6, %v80_v61  ;;  %v153_v10 = vsel %vm151_vm7, %v148_v5, %v150_v4  ;;  %v168_v23 = vpop.permute.xlu2 %167  ;;  %v1388_v4 = vor.u32 %v1475_v62, %v1385_v63 }
 0x19f   :  { %189 = vmatpush.bf16.msra.mxu0 %v84_v9  ;;  %232 = vmatpush.bf16.msra.mxu3 %v153_v10 }
 0x1a2   :  { %1376 = vmatmul.msk.bf16.vlgmr.msra.gmra.mxu3 %vm179_vm8, %v1372_v11 }
 0x1a3   :  { %1374 = vmatpush.bf16.msk.msra.mxu0 %vm1647_vm9, %v1576_v28 }
 0x1a5   :  { %v146_v13 = vpop.permute.xlu0 %145  ;;  %v163_v17 = vpop.permute.xlu1 %162 }
 0x1a6   :  { %191 = vmatmul.bf16.vlgmr.msra.gmra.mxu0 %v1368_v1  ;;  %v152_v14 = vsel %vm151_vm7, %v146_v13, %v148_v5 }
 0x1a7   :  { %204 = vmatpush.bf16.msra.mxu1 %v152_v14 }
 0x1aa   :  { %1375 = vmatmul.msk.bf16.vlgmr.msra.gmra.mxu1 %vm179_vm8, %v1372_v11 }
 0x221   :  { %v220_v15 = vpop.f32.mrf.mxu2 }
 0x222   :  { %v221_v19 = vadd.f32 %v220_v15, %v163_v17 }
 0x223   :  { %v192_v16 = vpop.f32.mrf.mxu0 }
 0x224   :  { %v193_v20 = vadd.f32 %v192_v16, %v163_v17 }
 0x225   :  { %v234_v18 = vpop.f32.mrf.mxu3 }
 0x226   :  { %v235_v24 = vadd.f32 %v234_v18, %v221_v19 }
 0x227   :  { %v206_v21 = vpop.f32.mrf.mxu1 }
 0x228   :  { %v207_v25 = vadd.f32 %v206_v21, %v193_v20  ;;  %v1658_v29 = vmul.f32 %v235_v24, %v1559_v8 }
 0x229   :  { %v222_v22 = vpop.f32.mrf.mxu2 }
 0x22a   :  { %v223_v27 = vadd.f32 %v222_v22, %v168_v23  ;;  %v1661_v30 = vmul.f32 %v207_v25, %v1557_v7  ;;  %v1383_v22 = vld [vmem:[%s2215_s1 + $0x10] sm:$0xf] }
 0x22b   :  { %v194_v26 = vpop.f32.mrf.mxu0 }
 0x22c   :  { %v195_v31 = vadd.f32 %v194_v26, %v168_v23  ;;  %v243_v35 = vpack.c.bf16 %v1658_v29, %v1661_v30  ;;  %v1476_v23 = vld [vmem:[%s2215_s1 + $0x14] sm:$0xf0] }
 0x22d   :  { %v236_v28 = vpop.f32.mrf.mxu3  ;;  %v1384_v24 = vor.u32 %v1476_v23, %v1383_v22 }
 0x22e   :  { %v237_v32 = vadd.f32 %v236_v28, %v223_v27  ;;  %v248_v39 = vunpack.c.h.b16 %v243_v35  ;;  %v247_v41 = vunpack.c.l.b16 %v243_v35 }
 0x22f   :  { %v208_v33 = vpop.f32.mrf.mxu1 }
 0x230   :  { %v209_v34 = vadd.f32 %v208_v33, %v195_v31  ;;  %v1666_v36 = vmul.f32 %v237_v32, %v1559_v8 }
 0x232   :  { %v1669_v37 = vmul.f32 %v209_v34, %v1557_v7 }
 0x234   :  { %v244_v38 = vpack.c.bf16 %v1666_v36, %v1669_v37 }
 0x236   :  { %v250_v40 = vunpack.c.h.b16 %v244_v38  ;;  %v249_v42 = vunpack.c.l.b16 %v244_v38 }
 0x238   :  { %v1673_v43 = vpack.c.b16 %v250_v40, %v248_v39  ;;  %v1675_v44 = vpack.c.b16 %v249_v42, %v247_v41 }
 0x23a   :  { %255 = vrot.lane.b32.xlu1 %v1673_v43, %s1504_s30  ;;  %253 = vrot.lane.b32.xlu0 %v1675_v44, %s1504_s30 }
 0x2ac   :  { %v256_v45 = vpop.permute.xlu1 %255  ;;  %v1681_v46 = vpop.permute.xlu0 %253 }
 0x2ad   :  { %v263_v47 = vsel %vm65_vm0, %v256_v45, 0  ;;  %v1686_v48 = vsel %vm65_vm0, %v1681_v46, %v256_v45  ;;  %v260_v49 = vsel %vm65_vm0, 0, %v1681_v46 }
 0x2ae   :  { %322 = vrot.lane.b32.xlu0 %v263_v47, %s1506_s7  ;;  %310 = vrot.lane.b32.xlu1 %v1686_v48, %s1505_s6 }
 0x2af   :  { %320 = vrot.lane.b32.xlu2 %v1686_v48, %s1506_s7 }
 0x2b6   :  { %300 = vrot.lane.b32.xlu0 %v1686_v48, %s1507_s8  ;;  %302 = vrot.lane.b32.xlu1 %v263_v47, %s1507_s8 }
 0x2b7   :  { %312 = vrot.lane.b32.xlu2 %v263_v47, %s1505_s6 }
 0x2be   :  { %330 = vrot.lane.b32.xlu0 %v1686_v48, %s1511_s12  ;;  %288 = vrot.lane.b32.xlu1 %v1686_v48, %s1508_s9 }
 0x2bf   :  { %328 = vrot.lane.b32.xlu2 %v260_v49, %s1511_s12 }
 0x2c6   :  { %278 = vrot.lane.b32.xlu0 %v1686_v48, %s1509_s10  ;;  %280 = vrot.lane.b32.xlu1 %v263_v47, %s1509_s10 }
 0x2c7   :  { %290 = vrot.lane.b32.xlu2 %v263_v47, %s1508_s9 }
 0x2ce   :  { %268 = vrot.lane.b32.xlu0 %v1686_v48, %s1510_s11  ;;  %270 = vrot.lane.b32.xlu1 %v263_v47, %s1510_s11 }
 0x2cf   :  { %318 = vrot.lane.b32.xlu2 %v260_v49, %s1506_s7 }
 0x2d6   :  { %298 = vrot.lane.b32.xlu0 %v260_v49, %s1507_s8  ;;  %286 = vrot.lane.b32.xlu1 %v260_v49, %s1508_s9 }
 0x2d7   :  { %308 = vrot.lane.b32.xlu2 %v260_v49, %s1505_s6 }
 0x2de   :  { %266 = vrot.lane.b32.xlu0 %v260_v49, %s1510_s11  ;;  %332 = vrot.lane.b32.xlu1 %v263_v47, %s1511_s12 }
 0x2df   :  { %276 = vrot.lane.b32.xlu2 %v260_v49, %s1509_s10 }
 0x2e6   :  { %351 = vperm.xlu0 %1496, %v1380_v50  }
 0x2e7   :  { %346 = vperm.xlu2 %1498, %v1379_v51  }
 0x309   :  { %v321_v52 = vpop.permute.xlu2 %320 }
 0x311   :  { %v313_v53 = vpop.permute.xlu2 %312 }
 0x319   :  { %v329_v54 = vpop.permute.xlu2 %328 }
 0x320   :  { %v311_v55 = vpop.permute.xlu1 %310  ;;  %v323_v56 = vpop.permute.xlu0 %322 }
 0x321   :  { %v291_v57 = vpop.permute.xlu2 %290  ;;  %v325_v5 = vsel %vm140_vm1, %v321_v52, %v323_v56  ;;  %v315_v9 = vsel %vm129_vm2, %v311_v55, %v313_v53 }
 0x328   :  { %v303_v58 = vpop.permute.xlu1 %302  ;;  %v301_v59 = vpop.permute.xlu0 %300 }
 0x329   :  { %v319_v60 = vpop.permute.xlu2 %318  ;;  %v305_v13 = vsel %vm118_vm3, %v301_v59, %v303_v58 }
 0x32a   :  { %v324_v61 = vsel %vm140_vm1, %v319_v60, %v321_v52 }
 0x32b   :  { %366 = vmatpush.bf16.msrb.mxu1 %v324_v61 }
 0x330   :  { %v289_v0 = vpop.permute.xlu1 %288  ;;  %v331_v1 = vpop.permute.xlu0 %330 }
 0x331   :  { %v309_v2 = vpop.permute.xlu2 %308  ;;  %v334_v3 = vsel %vm151_vm7, %v329_v54, %v331_v1  ;;  %v293_v16 = vsel %vm105_vm4, %v289_v0, %v291_v57 }
 0x332   :  { %v314_v6 = vsel %vm129_vm2, %v309_v2, %v311_v55  ;;  %387 = vmatpush.bf16.msrb.mxu3 %v334_v3 }
 0x333   :  { %367 = vmatpush.bf16.msrb.mxu1 %v314_v6 }
 0x335   :  { %1391 = vmatmul.msk.bf16.vlgmr.msrb.gmra.mxu3 %vm179_vm8, %v1388_v4 }
 0x336   :  { %394 = vmatpush.bf16.msra.mxu3 %v325_v5 }
 0x338   :  { %v281_v10 = vpop.permute.xlu1 %280  ;;  %v279_v11 = vpop.permute.xlu0 %278 }
 0x339   :  { %v283_v17 = vsel %vm94_vm5, %v279_v11, %v281_v10  ;;  %v277_v28 = vpop.permute.xlu2 %276 }
 0x33a   :  { %395 = vmatpush.bf16.msra.mxu3 %v315_v9  ;;  %v282_v31 = vsel %vm94_vm5, %v277_v28, %v279_v11 }
 0x33e   :  { %396 = vmatpush.bf16.msra.mxu3 %v305_v13 }
 0x340   :  { %v271_v14 = vpop.permute.xlu1 %270  ;;  %v269_v15 = vpop.permute.xlu0 %268 }
 0x341   :  { %v273_v21 = vsel %vm83_vm6, %v269_v15, %v271_v14  ;;  %v347_v41 = vpop.permute.xlu2 %346  ;;  %v1395_v14 = vld [vmem:[%s2214_s2 + $0x20] sm:$0xff] }
 0x342   :  { %397 = vmatpush.bf16.msra.mxu3 %v1673_v43 }
 0x346   :  { %398 = vmatpush.bf16.msra.mxu3 %v293_v16 }
 0x348   :  { %v287_v18 = vpop.permute.xlu1 %286  ;;  %v299_v19 = vpop.permute.xlu0 %298 }
 0x349   :  { %v304_v20 = vsel %vm118_vm3, %v299_v19, %v301_v59  ;;  %v292_v27 = vsel %vm105_vm4, %v287_v18, %v289_v0 }
 0x34a   :  { %399 = vmatpush.bf16.msra.mxu3 %v283_v17  ;;  %368 = vmatpush.bf16.msrb.mxu1 %v304_v20 }
 0x34e   :  { %400 = vmatpush.bf16.msra.mxu3 %v273_v21  ;;  %369 = vmatpush.bf16.msrb.mxu1 %v1675_v44 }
 0x350   :  { %v333_v25 = vpop.permute.xlu1 %332  ;;  %v267_v32 = vpop.permute.xlu0 %266 }
 0x351   :  { %v335_v26 = vsel %vm151_vm7, %v331_v1, %v333_v25  ;;  %v272_v33 = vsel %vm83_vm6, %v267_v32, %v269_v15  ;;  %v1396_v15 = vld [vmem:[%s2214_s2 + $0x28] sm:$0xff] }
 0x352   :  { %401 = vmatpush.bf16.msra.mxu3 %v1686_v48  ;;  %370 = vmatpush.bf16.msrb.mxu1 %v292_v27 }
 0x355   :  { %402 = vmatmul.bf16.vlgmr.msra.gmra.mxu3 %v1384_v24 }
 0x356   :  { %415 = vmatpush.bf16.msrb.mxu3 %v335_v26  ;;  %371 = vmatpush.bf16.msrb.mxu1 %v282_v31 }
 0x358   :  { %v352_v45 = vpop.permute.xlu0 %351 }
 0x35a   :  { %372 = vmatpush.bf16.msrb.mxu1 %v272_v33 }
 0x35e   :  { %1390 = vmatpush.bf16.msk.msrb.mxu1 %vm1647_vm9, %v1681_v46 }
 0x361   :  { %374 = vmatmul.bf16.vlgmr.msrb.gmra.mxu1 %v1384_v24 }
 0x365   :  { %1392 = vmatmul.msk.bf16.vlgmr.msrb.gmra.mxu3 %vm179_vm8, %v1388_v4 }
 0x3b8   :  { %v389_v34 = vpop.f32.mrf.mxu3 }
 0x3c0   :  { %v391_v35 = vpop.f32.mrf.mxu3 }
 0x3d8   :  { %v403_v38 = vpop.f32.mrf.mxu3 }
 0x3d9   :  { %v404_v42 = vadd.f32 %v403_v38, %v347_v41 }
 0x3de   :  { %v375_v40 = vpop.f32.mrf.mxu1 }
 0x3df   :  { %v376_v43 = vadd.f32 %v375_v40, %v347_v41  ;;  %v1477_v41 = vld [vmem:[%s2215_s1 + $0x24] sm:$0xf] }
 0x3e0   :  { %v405_v39 = vpop.f32.mrf.mxu3 }
 0x3e1   :  { %v390_v50 = vadd.f32 %v389_v34, %v376_v43  ;;  %v406_v46 = vadd.f32 %v405_v39, %v352_v45 }
 0x3e3   :  { %v422_v53 = vmax.f32 %v390_v50, 0.0 }
 0x3e5   :  { %v426_v58 = vmul.f32 %v422_v53, %v1557_v7 }
 0x3e6   :  { %v377_v48 = vpop.f32.mrf.mxu1 }
 0x3e7   :  { %v378_v49 = vadd.f32 %v377_v48, %v352_v45 }
 0x3e8   :  { %v417_v44 = vpop.f32.mrf.mxu3 }
 0x3e9   :  { %v418_v47 = vadd.f32 %v417_v44, %v404_v42  ;;  %v392_v52 = vadd.f32 %v391_v35, %v378_v49  ;;  %v1401_v42 = vld [vmem:[%s2215_s1 + $0x28] sm:$0xf0] }
 0x3ea   :  { %v1404_v49 = vor.u32 %v1477_v41, %v1401_v42 }
 0x3eb   :  { %v423_v51 = vmax.f32 %v418_v47, 0.0  ;;  %v424_v56 = vmax.f32 %v392_v52, 0.0 }
 0x3ed   :  { %v427_v55 = vmul.f32 %v423_v51, %v1559_v8  ;;  %v428_v61 = vmul.f32 %v424_v56, %v1557_v7 }
 0x3ef   :  { %v430_v60 = vpack.c.bf16 %v427_v55, %v426_v58  ;;  %v1478_v55 = vld [vmem:[%s2215_s1 + $0x24] sm:$0xf0] }
 0x3f0   :  { %v419_v54 = vpop.f32.mrf.mxu3 }
 0x3f1   :  { %v420_v57 = vadd.f32 %v419_v54, %v406_v46  ;;  %v435_v0 = vunpack.c.h.b16 %v430_v60  ;;  %v434_v2 = vunpack.c.l.b16 %v430_v60  ;;  %v1399_v54 = vld [vmem:[%s2215_s1 + $0x20] sm:$0xf] }
 0x3f2   :  { %v1400_v56 = vor.u32 %v1478_v55, %v1399_v54 }
 0x3f3   :  { %v425_v59 = vmax.f32 %v420_v57, 0.0 }
 0x3f5   :  { %v429_v62 = vmul.f32 %v425_v59, %v1559_v8 }
 0x3f7   :  { %v431_v63 = vpack.c.bf16 %v429_v62, %v428_v61 }
 0x3f9   :  { %v437_v1 = vunpack.c.h.b16 %v431_v63  ;;  %v436_v3 = vunpack.c.l.b16 %v431_v63 }
 0x3fb   :  { %v1762_v4 = vpack.c.b16 %v437_v1, %v435_v0  ;;  %v438_v5 = vpack.c.b16 %v436_v3, %v434_v2 }
 0x3fd   :  { %442 = vrot.lane.b32.xlu2 %v1762_v4, %s1504_s30  ;;  %440 = vrot.lane.b32.xlu1 %v438_v5, %s1504_s30 }
 0x457   :  { %v443_v6 = vpop.permute.xlu2 %442 }
 0x458   :  { %v450_v13 = vsel %vm65_vm0, %v443_v6, 0 }
 0x46f   :  { %v1767_v9 = vpop.permute.xlu1 %440 }
 0x470   :  { %v1771_v10 = vsel %vm65_vm0, %v1767_v9, %v443_v6  ;;  %v447_v11 = vsel %vm65_vm0, 0, %v1767_v9 }
 0x471   :  { %495 = vrot.lane.b32.xlu2 %v447_v11, %s1505_s6  ;;  %505 = vrot.lane.b32.xlu0 %v447_v11, %s1506_s7 }
 0x472   :  { %507 = vrot.lane.b32.xlu1 %v1771_v10, %s1506_s7 }
 0x479   :  { %485 = vrot.lane.b32.xlu2 %v447_v11, %s1507_s8  ;;  %497 = vrot.lane.b32.xlu0 %v1771_v10, %s1505_s6 }
 0x47a   :  { %509 = vrot.lane.b32.xlu1 %v450_v13, %s1506_s7 }
 0x481   :  { %489 = vrot.lane.b32.xlu2 %v450_v13, %s1507_s8  ;;  %487 = vrot.lane.b32.xlu0 %v1771_v10, %s1507_s8 }
 0x482   :  { %499 = vrot.lane.b32.xlu1 %v450_v13, %s1505_s6 }
 0x489   :  { %463 = vrot.lane.b32.xlu2 %v447_v11, %s1509_s10  ;;  %473 = vrot.lane.b32.xlu0 %v447_v11, %s1508_s9 }
 0x48a   :  { %475 = vrot.lane.b32.xlu1 %v1771_v10, %s1508_s9 }
 0x491   :  { %517 = vrot.lane.b32.xlu2 %v1771_v10, %s1511_s12  ;;  %465 = vrot.lane.b32.xlu0 %v1771_v10, %s1509_s10 }
 0x492   :  { %515 = vrot.lane.b32.xlu1 %v447_v11, %s1511_s12 }
 0x499   :  { %455 = vrot.lane.b32.xlu2 %v1771_v10, %s1510_s11  ;;  %477 = vrot.lane.b32.xlu0 %v450_v13, %s1508_s9 }
 0x49a   :  { %453 = vrot.lane.b32.xlu1 %v447_v11, %s1510_s11 }
 0x4a1   :  { %519 = vrot.lane.b32.xlu2 %v450_v13, %s1511_s12  ;;  %467 = vrot.lane.b32.xlu0 %v450_v13, %s1509_s10 }
 0x4a2   :  { %457 = vrot.lane.b32.xlu1 %v450_v13, %s1510_s11 }
 0x4a9   :  { %533 = vperm.xlu0 %1496, %v1395_v14  }
 0x4aa   :  { %538 = vperm.xlu1 %1497, %v1396_v15  }
 0x4cb   :  { %v496_v16 = vpop.permute.xlu2 %495 }
 0x4d3   :  { %v486_v17 = vpop.permute.xlu2 %485 }
 0x4db   :  { %v490_v18 = vpop.permute.xlu2 %489 }
 0x4e3   :  { %v506_v19 = vpop.permute.xlu0 %505  ;;  %v464_v21 = vpop.permute.xlu2 %463 }
 0x4e4   :  { %v508_v20 = vpop.permute.xlu1 %507 }
 0x4e5   :  { %v511_v22 = vsel %vm140_vm1, %v506_v19, %v508_v20 }
 0x4e6   :  { %553 = vmatpush.bf16.msrb.mxu2 %v511_v22 }
 0x4eb   :  { %v498_v23 = vpop.permute.xlu0 %497  ;;  %v518_v27 = vpop.permute.xlu2 %517 }
 0x4ec   :  { %v510_v24 = vpop.permute.xlu1 %509  ;;  %v501_v25 = vsel %vm129_vm2, %v496_v16, %v498_v23 }
 0x4ed   :  { %554 = vmatpush.bf16.msrb.mxu2 %v501_v25  ;;  %v512_v26 = vsel %vm140_vm1, %v508_v20, %v510_v24 }
 0x4ee   :  { %581 = vmatpush.bf16.msrb.mxu0 %v512_v26 }
 0x4f3   :  { %v488_v28 = vpop.permute.xlu0 %487  ;;  %v456_v34 = vpop.permute.xlu2 %455 }
 0x4f4   :  { %v500_v31 = vpop.permute.xlu1 %499  ;;  %v491_v32 = vsel %vm118_vm3, %v486_v17, %v488_v28  ;;  %v492_v35 = vsel %vm118_vm3, %v488_v28, %v490_v18 }
 0x4f5   :  { %555 = vmatpush.bf16.msrb.mxu2 %v491_v32  ;;  %v502_v33 = vsel %vm129_vm2, %v498_v23, %v500_v31 }
 0x4f6   :  { %582 = vmatpush.bf16.msrb.mxu0 %v502_v33 }
 0x4f9   :  { %556 = vmatpush.bf16.msrb.mxu2 %v438_v5 }
 0x4fa   :  { %583 = vmatpush.bf16.msrb.mxu0 %v492_v35 }
 0x4fb   :  { %v474_v38 = vpop.permute.xlu0 %473  ;;  %v520_v43 = vpop.permute.xlu2 %519 }
 0x4fc   :  { %v476_v39 = vpop.permute.xlu1 %475  ;;  %v522_v50 = vsel %vm151_vm7, %v518_v27, %v520_v43 }
 0x4fd   :  { %v479_v40 = vsel %vm105_vm4, %v474_v38, %v476_v39 }
 0x4fe   :  { %557 = vmatpush.bf16.msrb.mxu2 %v479_v40  ;;  %584 = vmatpush.bf16.msrb.mxu0 %v1762_v4  ;;  %v1412_v40 = vld [vmem:[%s2214_s2 + $0x38] sm:$0xff] }
 0x503   :  { %v466_v44 = vpop.permute.xlu0 %465 }
 0x504   :  { %v516_v45 = vpop.permute.xlu1 %515  ;;  %v469_v47 = vsel %vm94_vm5, %v464_v21, %v466_v44 }
 0x505   :  { %v521_v48 = vsel %vm151_vm7, %v516_v45, %v518_v27  ;;  %558 = vmatpush.bf16.msrb.mxu2 %v469_v47 }
 0x506   :  { %574 = vmatpush.bf16.msra.mxu1 %v521_v48 }
 0x509   :  { %1407 = vmatmul.msk.bf16.vlgmr.msra.gmra.mxu1 %vm179_vm8, %v1404_v49 }
 0x50a   :  { %602 = vmatpush.bf16.msrb.mxu1 %v522_v50 }
 0x50b   :  { %v478_v51 = vpop.permute.xlu0 %477 }
 0x50c   :  { %v454_v52 = vpop.permute.xlu1 %453  ;;  %v480_v46 = vsel %vm105_vm4, %v476_v39, %v478_v51  ;;  %v1411_v39 = vld [vmem:[%s2214_s2 + $0x30] sm:$0xff] }
 0x50d   :  { %v459_v53 = vsel %vm83_vm6, %v454_v52, %v456_v34  ;;  %585 = vmatpush.bf16.msrb.mxu0 %v480_v46 }
 0x50e   :  { %559 = vmatpush.bf16.msrb.mxu2 %v459_v53 }
 0x512   :  { %1406 = vmatpush.bf16.msk.msrb.mxu2 %vm1647_vm9, %v1767_v9 }
 0x513   :  { %v468_v57 = vpop.permute.xlu0 %467 }
 0x514   :  { %v470_v58 = vsel %vm94_vm5, %v466_v44, %v468_v57  ;;  %v458_v59 = vpop.permute.xlu1 %457 }
 0x515   :  { %561 = vmatmul.bf16.vlgmr.msrb.gmra.mxu2 %v1400_v56  ;;  %586 = vmatpush.bf16.msrb.mxu0 %v470_v58  ;;  %v460_v60 = vsel %vm83_vm6, %v456_v34, %v458_v59 }
 0x519   :  { %587 = vmatpush.bf16.msrb.mxu0 %v460_v60  ;;  %1408 = vmatmul.msk.bf16.vlgmr.msrb.gmra.mxu1 %vm179_vm8, %v1404_v49 }
 0x51b   :  { %v534_v0 = vpop.permute.xlu0 %533 }
 0x51c   :  { %v539_v5 = vpop.permute.xlu1 %538 }
 0x51d   :  { %588 = vmatpush.bf16.msrb.mxu0 %v1771_v10 }
 0x520   :  { %589 = vmatmul.bf16.vlgmr.msrb.gmra.mxu0 %v1400_v56 }
 0x586   :  { %v576_v61 = vpop.f32.mrf.mxu1 }
 0x58e   :  { %v578_v62 = vpop.f32.mrf.mxu1 }
 0x596   :  { %v604_v1 = vpop.f32.mrf.mxu1 }
 0x598   :  { %v562_v63 = vpop.f32.mrf.mxu2 }
 0x599   :  { %v563_v3 = vadd.f32 %v562_v63, %v534_v0 }
 0x59b   :  { %v577_v13 = vadd.f32 %v576_v61, %v563_v3 }
 0x59d   :  { %v590_v2 = vpop.f32.mrf.mxu0  ;;  %v609_v10 = vmul.f32 %v577_v13, %v1557_v7 }
 0x59e   :  { %v591_v4 = vadd.f32 %v590_v2, %v534_v0  ;;  %v606_v18 = vpop.f32.mrf.mxu1 }
 0x59f   :  { %v1850_v22 = vadd.f32 %v609_v10, %v1661_v30  ;;  %v1480_v10 = vld [vmem:[%s2215_s1 + $0x34] sm:$0xf0] }
 0x5a0   :  { %v605_v6 = vadd.f32 %v604_v1, %v591_v4  ;;  %v564_v9 = vpop.f32.mrf.mxu2 }
 0x5a1   :  { %v565_v11 = vadd.f32 %v564_v9, %v539_v5  ;;  %v1479_v9 = vld [vmem:[%s2215_s1 + $0x34] sm:$0xf] }
 0x5a2   :  { %v610_v14 = vmul.f32 %v605_v6, %v1559_v8 }
 0x5a3   :  { %v579_v15 = vadd.f32 %v578_v62, %v565_v11  ;;  %v1417_v11 = vld [vmem:[%s2215_s1 + $0x38] sm:$0xf0] }
 0x5a4   :  { %v1846_v19 = vadd.f32 %v610_v14, %v1658_v29 }
 0x5a5   :  { %v592_v16 = vpop.f32.mrf.mxu0  ;;  %v611_v20 = vmul.f32 %v579_v15, %v1557_v7 }
 0x5a6   :  { %v593_v17 = vadd.f32 %v592_v16, %v539_v5  ;;  %v617_v26 = vpack.c.bf16 %v1846_v19, %v1850_v22  ;;  %v1415_v16 = vld [vmem:[%s2215_s1 + $0x30] sm:$0xf] }
 0x5a7   :  { %v1854_v24 = vadd.f32 %v611_v20, %v1669_v37 }
 0x5a8   :  { %v607_v21 = vadd.f32 %v606_v18, %v593_v17  ;;  %v622_v27 = vunpack.c.h.b16 %v617_v26  ;;  %v621_v31 = vunpack.c.l.b16 %v617_v26  ;;  %v1420_v17 = vor.u32 %v1479_v9, %v1417_v11 }
 0x5a9   :  { %v1416_v18 = vor.u32 %v1480_v10, %v1415_v16 }
 0x5aa   :  { %v612_v23 = vmul.f32 %v607_v21, %v1559_v8 }
 0x5ac   :  { %v1857_v25 = vadd.f32 %v612_v23, %v1666_v36 }
 0x5ae   :  { %v618_v29 = vpack.c.bf16 %v1857_v25, %v1854_v24 }
 0x5b0   :  { %v624_v28 = vunpack.c.h.b16 %v618_v29  ;;  %v623_v32 = vunpack.c.l.b16 %v618_v29 }
 0x5b2   :  { %v626_v30 = vpack.c.b16 %v624_v28, %v622_v27  ;;  %v625_v33 = vpack.c.b16 %v623_v32, %v621_v31 }
 0x5b4   :  { %629 = vrot.lane.b32.xlu0 %v626_v30, %s1504_s30  ;;  %627 = vrot.lane.b32.xlu2 %v625_v33, %s1504_s30 }
 0x60e   :  { %v1865_v37 = vpop.permute.xlu2 %627 }
 0x60f   :  { %v634_v36 = vsel %vm65_vm0, 0, %v1865_v37 }
 0x610   :  { %682 = vrot.lane.b32.xlu0 %v634_v36, %s1505_s6  ;;  %692 = vrot.lane.b32.xlu1 %v634_v36, %s1506_s7 }
 0x618   :  { %672 = vrot.lane.b32.xlu0 %v634_v36, %s1507_s8 }
 0x626   :  { %v630_v34 = vpop.permute.xlu0 %629 }
 0x627   :  { %v1874_v35 = vsel %vm65_vm0, %v1865_v37, %v630_v34  ;;  %v637_v38 = vsel %vm65_vm0, %v630_v34, 0 }
 0x628   :  { %676 = vrot.lane.b32.xlu0 %v637_v38, %s1507_s8  ;;  %684 = vrot.lane.b32.xlu1 %v1874_v35, %s1505_s6 }
 0x629   :  { %694 = vrot.lane.b32.xlu2 %v1874_v35, %s1506_s7 }
 0x630   :  { %650 = vrot.lane.b32.xlu0 %v634_v36, %s1509_s10  ;;  %674 = vrot.lane.b32.xlu1 %v1874_v35, %s1507_s8 }
 0x631   :  { %696 = vrot.lane.b32.xlu2 %v637_v38, %s1506_s7 }
 0x638   :  { %640 = vrot.lane.b32.xlu0 %v634_v36, %s1510_s11  ;;  %660 = vrot.lane.b32.xlu1 %v634_v36, %s1508_s9 }
 0x639   :  { %686 = vrot.lane.b32.xlu2 %v637_v38, %s1505_s6 }
 0x640   :  { %644 = vrot.lane.b32.xlu0 %v637_v38, %s1510_s11  ;;  %652 = vrot.lane.b32.xlu1 %v1874_v35, %s1509_s10 }
 0x641   :  { %662 = vrot.lane.b32.xlu2 %v1874_v35, %s1508_s9 }
 0x648   :  { %706 = vrot.lane.b32.xlu0 %v637_v38, %s1511_s12  ;;  %642 = vrot.lane.b32.xlu1 %v1874_v35, %s1510_s11 }
 0x649   :  { %664 = vrot.lane.b32.xlu2 %v637_v38, %s1508_s9 }
 0x650   :  { %702 = vrot.lane.b32.xlu1 %v634_v36, %s1511_s12 }
 0x651   :  { %654 = vrot.lane.b32.xlu2 %v637_v38, %s1509_s10 }
 0x658   :  { %720 = vperm.xlu1 %1497, %v1411_v39  }
 0x659   :  { %704 = vrot.lane.b32.xlu2 %v1874_v35, %s1511_s12 }
 0x661   :  { %725 = vperm.xlu2 %1498, %v1412_v40  }
 0x682   :  { %v693_v41 = vpop.permute.xlu1 %692  ;;  %v683_v44 = vpop.permute.xlu0 %682 }
 0x683   :  { %v695_v42 = vpop.permute.xlu2 %694 }
 0x684   :  { %v698_v43 = vsel %vm140_vm1, %v693_v41, %v695_v42 }
 0x685   :  { %740 = vmatpush.bf16.msra.mxu3 %v698_v43 }
 0x68a   :  { %v673_v48 = vpop.permute.xlu0 %672 }
 0x68b   :  { %v697_v45 = vpop.permute.xlu2 %696 }
 0x68c   :  { %v699_v47 = vsel %vm140_vm1, %v695_v42, %v697_v45 }
 0x68d   :  { %768 = vmatpush.bf16.msra.mxu1 %v699_v47 }
 0x693   :  { %v687_v49 = vpop.permute.xlu2 %686 }
 0x69a   :  { %v677_v50 = vpop.permute.xlu0 %676  ;;  %v685_v51 = vpop.permute.xlu1 %684 }
 0x69b   :  { %v663_v52 = vpop.permute.xlu2 %662  ;;  %v688_v46 = vsel %vm129_vm2, %v683_v44, %v685_v51  ;;  %v689_v53 = vsel %vm129_vm2, %v685_v51, %v687_v49 }
 0x69c   :  { %741 = vmatpush.bf16.msra.mxu3 %v688_v46  ;;  %769 = vmatpush.bf16.msra.mxu1 %v689_v53 }
 0x6a2   :  { %v651_v54 = vpop.permute.xlu0 %650  ;;  %v675_v55 = vpop.permute.xlu1 %674 }
 0x6a3   :  { %v678_v56 = vsel %vm118_vm3, %v673_v48, %v675_v55  ;;  %v679_v57 = vsel %vm118_vm3, %v675_v55, %v677_v50  ;;  %v665_v58 = vpop.permute.xlu2 %664 }
 0x6a4   :  { %742 = vmatpush.bf16.msra.mxu3 %v678_v56  ;;  %770 = vmatpush.bf16.msra.mxu1 %v679_v57  ;;  %v667_v62 = vsel %vm105_vm4, %v663_v52, %v665_v58 }
 0x6a8   :  { %743 = vmatpush.bf16.msra.mxu3 %v625_v33  ;;  %771 = vmatpush.bf16.msra.mxu1 %v626_v30 }
 0x6aa   :  { %v641_v59 = vpop.permute.xlu0 %640  ;;  %v661_v60 = vpop.permute.xlu1 %660 }
 0x6ab   :  { %v666_v61 = vsel %vm105_vm4, %v661_v60, %v663_v52  ;;  %v655_v63 = vpop.permute.xlu2 %654 }
 0x6ac   :  { %744 = vmatpush.bf16.msra.mxu3 %v666_v61  ;;  %772 = vmatpush.bf16.msra.mxu1 %v667_v62 }
 0x6b2   :  { %v645_v0 = vpop.permute.xlu0 %644  ;;  %v653_v1 = vpop.permute.xlu1 %652 }
 0x6b3   :  { %v656_v2 = vsel %vm94_vm5, %v651_v54, %v653_v1  ;;  %v657_v3 = vsel %vm94_vm5, %v653_v1, %v655_v63  ;;  %v705_v4 = vpop.permute.xlu2 %704  ;;  %v1428_v1 = vld [vmem:[%s2214_s2 + $0x48] sm:$0xff] }
 0x6b4   :  { %745 = vmatpush.bf16.msra.mxu3 %v656_v2  ;;  %773 = vmatpush.bf16.msra.mxu1 %v657_v3 }
 0x6ba   :  { %v707_v5 = vpop.permute.xlu0 %706  ;;  %v643_v6 = vpop.permute.xlu1 %642 }
 0x6bb   :  { %v709_v13 = vsel %vm151_vm7, %v705_v4, %v707_v5  ;;  %v646_v14 = vsel %vm83_vm6, %v641_v59, %v643_v6  ;;  %v647_v15 = vsel %vm83_vm6, %v643_v6, %v645_v0  ;;  %v726_v30 = vpop.permute.xlu2 %725  ;;  %v1427_v0 = vld [vmem:[%s2214_s2 + $0x40] sm:$0xff] }
 0x6bc   :  { %746 = vmatpush.bf16.msra.mxu3 %v646_v14  ;;  %774 = vmatpush.bf16.msra.mxu1 %v647_v15 }
 0x6bd   :  { %789 = vmatpush.bf16.msra.mxu0 %v709_v13 }
 0x6c0   :  { %1422 = vmatpush.bf16.msk.msra.mxu3 %vm1647_vm9, %v1865_v37  ;;  %775 = vmatpush.bf16.msra.mxu1 %v1874_v35 }
 0x6c1   :  { %1424 = vmatmul.msk.bf16.vlgmr.msra.gmra.mxu0 %vm179_vm8, %v1420_v17 }
 0x6c2   :  { %v703_v20 = vpop.permute.xlu1 %702 }
 0x6c3   :  { %v708_v21 = vsel %vm151_vm7, %v703_v20, %v705_v4  ;;  %748 = vmatmul.bf16.vlgmr.msra.gmra.mxu3 %v1416_v18  ;;  %776 = vmatmul.bf16.vlgmr.msra.gmra.mxu1 %v1416_v18 }
 0x6c4   :  { %761 = vmatpush.bf16.msra.mxu2 %v708_v21 }
 0x6c7   :  { %1423 = vmatmul.msk.bf16.vlgmr.msra.gmra.mxu2 %vm179_vm8, %v1420_v17 }
 0x6ca   :  { %v721_v27 = vpop.permute.xlu1 %720 }
 0x73e   :  { %v791_v26 = vpop.f32.mrf.mxu0 }
 0x740   :  { %v777_v23 = vpop.f32.mrf.mxu1 }
 0x741   :  { %v778_v31 = vadd.f32 %v777_v23, %v721_v27 }
 0x743   :  { %v792_v35 = vadd.f32 %v791_v26, %v778_v31 }
 0x745   :  { %v797_v41 = vmax.f32 %v792_v35, 0.0 }
 0x746   :  { %v749_v29 = vpop.f32.mrf.mxu3  ;;  %v793_v34 = vpop.f32.mrf.mxu0 }
 0x747   :  { %v750_v32 = vadd.f32 %v749_v29, %v721_v27  ;;  %v801_v48 = vmul.f32 %v797_v41, %v1559_v8 }
 0x748   :  { %v779_v28 = vpop.f32.mrf.mxu1 }
 0x749   :  { %v780_v37 = vadd.f32 %v779_v28, %v726_v30 }
 0x74a   :  { %v763_v33 = vpop.f32.mrf.mxu2 }
 0x74b   :  { %v764_v36 = vadd.f32 %v763_v33, %v750_v32  ;;  %v794_v40 = vadd.f32 %v793_v34, %v780_v37  ;;  %v1482_v34 = vld [vmem:[%s2215_s1 + $0x44] sm:$0xf0] }
 0x74d   :  { %v796_v39 = vmax.f32 %v764_v36, 0.0  ;;  %v799_v45 = vmax.f32 %v794_v40, 0.0  ;;  %v1431_v36 = vld [vmem:[%s2215_s1 + $0x40] sm:$0xf] }
 0x74e   :  { %v751_v38 = vpop.f32.mrf.mxu3  ;;  %v1432_v35 = vor.u32 %v1482_v34, %v1431_v36 }
 0x74f   :  { %v752_v42 = vadd.f32 %v751_v38, %v726_v30  ;;  %v800_v44 = vmul.f32 %v796_v39, %v1557_v7  ;;  %v803_v51 = vmul.f32 %v799_v45, %v1559_v8 }
 0x751   :  { %v804_v50 = vpack.c.bf16 %v801_v48, %v800_v44 }
 0x752   :  { %v765_v43 = vpop.f32.mrf.mxu2 }
 0x753   :  { %v766_v47 = vadd.f32 %v765_v43, %v752_v42  ;;  %v809_v53 = vunpack.c.h.b16 %v804_v50  ;;  %v808_v55 = vunpack.c.l.b16 %v804_v50  ;;  %v1481_v42 = vld [vmem:[%s2215_s1 + $0x44] sm:$0xf]  ;;  %v1433_v43 = vld [vmem:[%s2215_s1 + $0x48] sm:$0xf0] }
 0x754   :  { %v1436_v50 = vor.u32 %v1481_v42, %v1433_v43 }
 0x755   :  { %v798_v49 = vmax.f32 %v766_v47, 0.0 }
 0x757   :  { %v802_v52 = vmul.f32 %v798_v49, %v1557_v7 }
 0x759   :  { %v805_v46 = vpack.c.bf16 %v803_v51, %v802_v52 }
 0x75b   :  { %v811_v54 = vunpack.c.h.b16 %v805_v46  ;;  %v810_v56 = vunpack.c.l.b16 %v805_v46 }
 0x75d   :  { %v813_v57 = vpack.c.b16 %v811_v54, %v809_v53  ;;  %v812_v58 = vpack.c.b16 %v810_v56, %v808_v55 }
 0x75f   :  { %816 = vrot.lane.b32.xlu1 %v813_v57, %s1504_s30  ;;  %814 = vrot.lane.b32.xlu0 %v812_v58, %s1504_s30 }
 0x7d1   :  { %v817_v59 = vpop.permute.xlu1 %816  ;;  %v1946_v60 = vpop.permute.xlu0 %814 }
 0x7d2   :  { %v1950_v61 = vsel %vm65_vm0, %v1946_v60, %v817_v59  ;;  %v821_v62 = vsel %vm65_vm0, 0, %v1946_v60  ;;  %v824_v63 = vsel %vm65_vm0, %v817_v59, 0 }
 0x7d3   :  { %869 = vrot.lane.b32.xlu1 %v821_v62, %s1505_s6  ;;  %879 = vrot.lane.b32.xlu2 %v821_v62, %s1506_s7 }
 0x7d4   :  { %881 = vrot.lane.b32.xlu0 %v1950_v61, %s1506_s7 }
 0x7db   :  { %859 = vrot.lane.b32.xlu1 %v821_v62, %s1507_s8  ;;  %871 = vrot.lane.b32.xlu2 %v1950_v61, %s1505_s6 }
 0x7dc   :  { %883 = vrot.lane.b32.xlu0 %v824_v63, %s1506_s7 }
 0x7e3   :  { %863 = vrot.lane.b32.xlu1 %v824_v63, %s1507_s8  ;;  %861 = vrot.lane.b32.xlu2 %v1950_v61, %s1507_s8 }
 0x7e4   :  { %873 = vrot.lane.b32.xlu0 %v824_v63, %s1505_s6 }
 0x7eb   :  { %837 = vrot.lane.b32.xlu1 %v821_v62, %s1509_s10  ;;  %847 = vrot.lane.b32.xlu2 %v821_v62, %s1508_s9 }
 0x7ec   :  { %849 = vrot.lane.b32.xlu0 %v1950_v61, %s1508_s9 }
 0x7f3   :  { %827 = vrot.lane.b32.xlu1 %v821_v62, %s1510_s11  ;;  %839 = vrot.lane.b32.xlu2 %v1950_v61, %s1509_s10 }
 0x7f4   :  { %851 = vrot.lane.b32.xlu0 %v824_v63, %s1508_s9 }
 0x7fb   :  { %831 = vrot.lane.b32.xlu1 %v824_v63, %s1510_s11  ;;  %829 = vrot.lane.b32.xlu2 %v1950_v61, %s1510_s11 }
 0x7fc   :  { %841 = vrot.lane.b32.xlu0 %v824_v63, %s1509_s10 }
 0x803   :  { %893 = vrot.lane.b32.xlu1 %v824_v63, %s1511_s12  ;;  %889 = vrot.lane.b32.xlu2 %v821_v62, %s1511_s12 }
 0x804   :  { %891 = vrot.lane.b32.xlu0 %v1950_v61, %s1511_s12 }
 0x80b   :  { %907 = vperm.xlu2 %1498, %v1427_v0  }
 0x80c   :  { %912 = vperm.xlu0 %1496, %v1428_v1  }
 0x82d   :  { %v880_v2 = vpop.permute.xlu2 %879 }
 0x835   :  { %v872_v3 = vpop.permute.xlu2 %871 }
 0x83d   :  { %v862_v6 = vpop.permute.xlu2 %861 }
 0x845   :  { %v870_v4 = vpop.permute.xlu1 %869  ;;  %v848_v10 = vpop.permute.xlu2 %847 }
 0x846   :  { %v882_v5 = vpop.permute.xlu0 %881  ;;  %v875_v11 = vsel %vm129_vm2, %v870_v4, %v872_v3 }
 0x847   :  { %v885_v9 = vsel %vm140_vm1, %v880_v2, %v882_v5 }
 0x848   :  { %927 = vmatpush.bf16.msrb.mxu2 %v885_v9 }
 0x84c   :  { %928 = vmatpush.bf16.msrb.mxu2 %v875_v11 }
 0x84d   :  { %v860_v13 = vpop.permute.xlu1 %859  ;;  %v840_v21 = vpop.permute.xlu2 %839 }
 0x84e   :  { %v884_v14 = vpop.permute.xlu0 %883  ;;  %v865_v15 = vsel %vm118_vm3, %v860_v13, %v862_v6 }
 0x84f   :  { %v886_v16 = vsel %vm140_vm1, %v882_v5, %v884_v14 }
 0x850   :  { %929 = vmatpush.bf16.msrb.mxu2 %v865_v15  ;;  %955 = vmatpush.bf16.msrb.mxu0 %v886_v16 }
 0x854   :  { %930 = vmatpush.bf16.msrb.mxu2 %v812_v58 }
 0x855   :  { %v864_v17 = vpop.permute.xlu1 %863  ;;  %v830_v31 = vpop.permute.xlu2 %829 }
 0x856   :  { %v874_v18 = vpop.permute.xlu0 %873  ;;  %v866_v23 = vsel %vm118_vm3, %v862_v6, %v864_v17 }
 0x857   :  { %v876_v20 = vsel %vm129_vm2, %v872_v3, %v874_v18 }
 0x858   :  { %956 = vmatpush.bf16.msrb.mxu0 %v876_v20 }
 0x85c   :  { %957 = vmatpush.bf16.msrb.mxu0 %v866_v23 }
 0x85d   :  { %v838_v26 = vpop.permute.xlu1 %837  ;;  %v890_v45 = vpop.permute.xlu2 %889 }
 0x85e   :  { %v850_v29 = vpop.permute.xlu0 %849  ;;  %v843_v28 = vsel %vm94_vm5, %v838_v26, %v840_v21 }
 0x85f   :  { %v853_v27 = vsel %vm105_vm4, %v848_v10, %v850_v29 }
 0x860   :  { %931 = vmatpush.bf16.msrb.mxu2 %v853_v27  ;;  %958 = vmatpush.bf16.msrb.mxu0 %v813_v57  ;;  %v1443_v27 = vld [vmem:[%s2214_s2 + $0x50] sm:$0xff] }
 0x864   :  { %932 = vmatpush.bf16.msrb.mxu2 %v843_v28  ;;  %v1444_v28 = vld [vmem:[%s2214_s2 + $0x58] sm:$0xff] }
 0x865   :  { %v828_v32 = vpop.permute.xlu1 %827  ;;  %v908_v53 = vpop.permute.xlu2 %907 }
 0x866   :  { %v852_v30 = vpop.permute.xlu0 %851  ;;  %v833_v33 = vsel %vm83_vm6, %v828_v32, %v830_v31 }
 0x867   :  { %v854_v37 = vsel %vm105_vm4, %v850_v29, %v852_v30 }
 0x868   :  { %933 = vmatpush.bf16.msrb.mxu2 %v833_v33  ;;  %959 = vmatpush.bf16.msrb.mxu0 %v854_v37 }
 0x86c   :  { %1438 = vmatpush.bf16.msk.msrb.mxu2 %vm1647_vm9, %v1946_v60 }
 0x86d   :  { %v832_v38 = vpop.permute.xlu1 %831 }
 0x86e   :  { %v842_v39 = vpop.permute.xlu0 %841  ;;  %v834_v41 = vsel %vm83_vm6, %v830_v31, %v832_v38 }
 0x86f   :  { %935 = vmatmul.bf16.vlgmr.msrb.gmra.mxu2 %v1432_v35  ;;  %v844_v40 = vsel %vm94_vm5, %v840_v21, %v842_v39 }
 0x870   :  { %960 = vmatpush.bf16.msrb.mxu0 %v844_v40 }
 0x874   :  { %961 = vmatpush.bf16.msrb.mxu0 %v834_v41 }
 0x875   :  { %v894_v44 = vpop.permute.xlu1 %893 }
 0x876   :  { %v892_v47 = vpop.permute.xlu0 %891 }
 0x877   :  { %v895_v48 = vsel %vm151_vm7, %v890_v45, %v892_v47  ;;  %v896_v49 = vsel %vm151_vm7, %v892_v47, %v894_v44 }
 0x878   :  { %948 = vmatpush.bf16.msrb.mxu3 %v895_v48  ;;  %962 = vmatpush.bf16.msrb.mxu0 %v1950_v61 }
 0x879   :  { %976 = vmatpush.bf16.msrb.mxu1 %v896_v49 }
 0x87b   :  { %1439 = vmatmul.msk.bf16.vlgmr.msrb.gmra.mxu3 %vm179_vm8, %v1436_v50  ;;  %963 = vmatmul.bf16.vlgmr.msrb.gmra.mxu0 %v1432_v35 }
 0x87c   :  { %1440 = vmatmul.msk.bf16.vlgmr.msrb.gmra.mxu1 %vm179_vm8, %v1436_v50 }
 0x87e   :  { %v913_v58 = vpop.permute.xlu0 %912 }
 0x8f2   :  { %v936_v51 = vpop.f32.mrf.mxu2 }
 0x8f3   :  { %v937_v54 = vadd.f32 %v936_v51, %v908_v53 }
 0x8f8   :  { %v964_v52 = vpop.f32.mrf.mxu0 }
 0x8f9   :  { %v978_v46 = vpop.f32.mrf.mxu1  ;;  %v965_v55 = vadd.f32 %v964_v52, %v908_v53 }
 0x8fa   :  { %v938_v63 = vpop.f32.mrf.mxu2 }
 0x8fb   :  { %v979_v60 = vadd.f32 %v978_v46, %v965_v55  ;;  %v939_v3 = vadd.f32 %v938_v63, %v913_v58 }
 0x8fd   :  { %v984_v2 = vmul.f32 %v979_v60, %v1559_v8  ;;  %v1484_v60 = vld [vmem:[%s2215_s1 + $0x54] sm:$0xf0] }
 0x8fe   :  { %v950_v56 = vpop.f32.mrf.mxu3 }
 0x8ff   :  { %v951_v57 = vadd.f32 %v950_v56, %v937_v54  ;;  %v988_v11 = vadd.f32 %v984_v2, %v1846_v19 }
 0x900   :  { %v966_v59 = vpop.f32.mrf.mxu0 }
 0x901   :  { %v967_v62 = vadd.f32 %v966_v59, %v913_v58  ;;  %v980_v61 = vpop.f32.mrf.mxu1  ;;  %v983_v0 = vmul.f32 %v951_v57, %v1557_v7  ;;  %v1447_v59 = vld [vmem:[%s2215_s1 + $0x50] sm:$0xf] }
 0x903   :  { %v981_v1 = vadd.f32 %v980_v61, %v967_v62  ;;  %v987_v5 = vadd.f32 %v983_v0, %v1850_v22  ;;  %v1448_v62 = vor.u32 %v1484_v60, %v1447_v59  ;;  %v1483_v61 = vld [vmem:[%s2215_s1 + $0x54] sm:$0xf]  ;;  %v1449_v0 = vld [vmem:[%s2215_s1 + $0x58] sm:$0xf0] }
 0x905   :  { %v986_v6 = vmul.f32 %v981_v1, %v1559_v8  ;;  %v991_v14 = vpack.c.bf16 %v988_v11, %v987_v5 }
 0x906   :  { %v952_v4 = vpop.f32.mrf.mxu3 }
 0x907   :  { %v953_v9 = vadd.f32 %v952_v4, %v939_v3  ;;  %v990_v15 = vadd.f32 %v986_v6, %v1857_v25  ;;  %v996_v17 = vunpack.c.h.b16 %v991_v14  ;;  %v995_v20 = vunpack.c.l.b16 %v991_v14 }
 0x908   :  { %v1452_v6 = vor.u32 %v1483_v61, %v1449_v0 }
 0x909   :  { %v985_v13 = vmul.f32 %v953_v9, %v1557_v7 }
 0x90b   :  { %v989_v16 = vadd.f32 %v985_v13, %v1854_v24 }
 0x90d   :  { %v992_v10 = vpack.c.bf16 %v990_v15, %v989_v16 }
 0x90f   :  { %v998_v18 = vunpack.c.h.b16 %v992_v10  ;;  %v997_v21 = vunpack.c.l.b16 %v992_v10 }
 0x911   :  { %v1000_v23 = vpack.c.b16 %v998_v18, %v996_v17  ;;  %v999_v26 = vpack.c.b16 %v997_v21, %v995_v20 }
 0x913   :  { %1003 = vrot.lane.b32.xlu2 %v1000_v23, %s1504_s30  ;;  %1001 = vrot.lane.b32.xlu1 %v999_v26, %s1504_s30 }
 0x96d   :  { %v1004_v22 = vpop.permute.xlu2 %1003 }
 0x96e   :  { %v1011_v25 = vsel %vm65_vm0, %v1004_v22, 0 }
 0x985   :  { %v2031_v19 = vpop.permute.xlu1 %1001 }
 0x986   :  { %v2035_v29 = vsel %vm65_vm0, %v2031_v19, %v1004_v22  ;;  %v1008_v24 = vsel %vm65_vm0, 0, %v2031_v19 }
 0x987   :  { %1056 = vrot.lane.b32.xlu2 %v1008_v24, %s1505_s6  ;;  %1066 = vrot.lane.b32.xlu0 %v1008_v24, %s1506_s7 }
 0x988   :  { %1068 = vrot.lane.b32.xlu1 %v2035_v29, %s1506_s7 }
 0x98f   :  { %1046 = vrot.lane.b32.xlu2 %v1008_v24, %s1507_s8  ;;  %1058 = vrot.lane.b32.xlu0 %v2035_v29, %s1505_s6 }
 0x990   :  { %1070 = vrot.lane.b32.xlu1 %v1011_v25, %s1506_s7 }
 0x997   :  { %1050 = vrot.lane.b32.xlu2 %v1011_v25, %s1507_s8  ;;  %1048 = vrot.lane.b32.xlu0 %v2035_v29, %s1507_s8 }
 0x998   :  { %1060 = vrot.lane.b32.xlu1 %v1011_v25, %s1505_s6 }
 0x99f   :  { %1024 = vrot.lane.b32.xlu2 %v1008_v24, %s1509_s10  ;;  %1034 = vrot.lane.b32.xlu0 %v1008_v24, %s1508_s9 }
 0x9a0   :  { %1036 = vrot.lane.b32.xlu1 %v2035_v29, %s1508_s9 }
 0x9a7   :  { %1014 = vrot.lane.b32.xlu2 %v1008_v24, %s1510_s11  ;;  %1026 = vrot.lane.b32.xlu0 %v2035_v29, %s1509_s10 }
 0x9a8   :  { %1038 = vrot.lane.b32.xlu1 %v1011_v25, %s1508_s9 }
 0x9af   :  { %1018 = vrot.lane.b32.xlu2 %v1011_v25, %s1510_s11  ;;  %1016 = vrot.lane.b32.xlu0 %v2035_v29, %s1510_s11 }
 0x9b0   :  { %1028 = vrot.lane.b32.xlu1 %v1011_v25, %s1509_s10 }
 0x9b7   :  { %1080 = vrot.lane.b32.xlu2 %v1011_v25, %s1511_s12  ;;  %1076 = vrot.lane.b32.xlu0 %v1008_v24, %s1511_s12 }
 0x9b8   :  { %1078 = vrot.lane.b32.xlu1 %v2035_v29, %s1511_s12 }
 0x9bf   :  { %1094 = vperm.xlu0 %1496, %v1443_v27  }
 0x9c0   :  { %1099 = vperm.xlu1 %1497, %v1444_v28  }
 0x9e1   :  { %v1057_v31 = vpop.permute.xlu2 %1056 }
 0x9e9   :  { %v1047_v32 = vpop.permute.xlu2 %1046 }
 0x9f1   :  { %v1051_v34 = vpop.permute.xlu2 %1050 }
 0x9f9   :  { %v1067_v30 = vpop.permute.xlu0 %1066  ;;  %v1025_v44 = vpop.permute.xlu2 %1024 }
 0x9fa   :  { %v1069_v33 = vpop.permute.xlu1 %1068 }
 0x9fb   :  { %v1072_v37 = vsel %vm140_vm1, %v1067_v30, %v1069_v33 }
 0x9fc   :  { %1114 = vmatpush.bf16.msra.mxu3 %v1072_v37 }
 0xa01   :  { %v1059_v36 = vpop.permute.xlu0 %1058  ;;  %v1015_v50 = vpop.permute.xlu2 %1014 }
 0xa02   :  { %v1071_v35 = vpop.permute.xlu1 %1070  ;;  %v1062_v38 = vsel %vm129_vm2, %v1057_v31, %v1059_v36 }
 0xa03   :  { %v1073_v39 = vsel %vm140_vm1, %v1069_v33, %v1071_v35  ;;  %1115 = vmatpush.bf16.msra.mxu3 %v1062_v38 }
 0xa04   :  { %1142 = vmatpush.bf16.msra.mxu1 %v1073_v39 }
 0xa09   :  { %v1049_v40 = vpop.permute.xlu0 %1048  ;;  %v1019_v54 = vpop.permute.xlu2 %1018 }
 0xa0a   :  { %v1061_v41 = vpop.permute.xlu1 %1060  ;;  %v1052_v42 = vsel %vm118_vm3, %v1047_v32, %v1049_v40  ;;  %v1053_v45 = vsel %vm118_vm3, %v1049_v40, %v1051_v34 }
 0xa0b   :  { %1116 = vmatpush.bf16.msra.mxu3 %v1052_v42  ;;  %v1063_v43 = vsel %vm129_vm2, %v1059_v36, %v1061_v41 }
 0xa0c   :  { %1143 = vmatpush.bf16.msra.mxu1 %v1063_v43  ;;  %v1459_v43 = vld [vmem:[%s2214_s2 + $0x60] sm:$0xff] }
 0xa0f   :  { %1117 = vmatpush.bf16.msra.mxu3 %v999_v26 }
 0xa10   :  { %1144 = vmatpush.bf16.msra.mxu1 %v1053_v45 }
 0xa11   :  { %v1035_v47 = vpop.permute.xlu0 %1034  ;;  %v1081_v2 = vpop.permute.xlu2 %1080 }
 0xa12   :  { %v1037_v48 = vpop.permute.xlu1 %1036 }
 0xa13   :  { %v1040_v49 = vsel %vm105_vm4, %v1035_v47, %v1037_v48 }
 0xa14   :  { %1118 = vmatpush.bf16.msra.mxu3 %v1040_v49  ;;  %1145 = vmatpush.bf16.msra.mxu1 %v1000_v23 }
 0xa19   :  { %v1027_v51 = vpop.permute.xlu0 %1026 }
 0xa1a   :  { %v1039_v52 = vpop.permute.xlu1 %1038  ;;  %v1030_v46 = vsel %vm94_vm5, %v1025_v44, %v1027_v51  ;;  %v1460_v44 = vld [vmem:[%s2214_s2 + $0x68] sm:$0xff] }
 0xa1b   :  { %1119 = vmatpush.bf16.msra.mxu3 %v1030_v46  ;;  %v1041_v53 = vsel %vm105_vm4, %v1037_v48, %v1039_v52 }
 0xa1c   :  { %1146 = vmatpush.bf16.msra.mxu1 %v1041_v53 }
 0xa21   :  { %v1017_v55 = vpop.permute.xlu0 %1016 }
 0xa22   :  { %v1029_v56 = vpop.permute.xlu1 %1028  ;;  %v1020_v57 = vsel %vm83_vm6, %v1015_v50, %v1017_v55  ;;  %v1021_v63 = vsel %vm83_vm6, %v1017_v55, %v1019_v54 }
 0xa23   :  { %1120 = vmatpush.bf16.msra.mxu3 %v1020_v57  ;;  %v1031_v58 = vsel %vm94_vm5, %v1027_v51, %v1029_v56 }
 0xa24   :  { %1147 = vmatpush.bf16.msra.mxu1 %v1031_v58 }
 0xa27   :  { %1454 = vmatpush.bf16.msk.msra.mxu3 %vm1647_vm9, %v2031_v19 }
 0xa28   :  { %1148 = vmatpush.bf16.msra.mxu1 %v1021_v63 }
 0xa29   :  { %v1077_v1 = vpop.permute.xlu0 %1076 }
 0xa2a   :  { %v1079_v3 = vpop.permute.xlu1 %1078  ;;  %1122 = vmatmul.bf16.vlgmr.msra.gmra.mxu3 %v1448_v62 }
 0xa2b   :  { %v1082_v4 = vsel %vm151_vm7, %v1077_v1, %v1079_v3  ;;  %v1083_v5 = vsel %vm151_vm7, %v1079_v3, %v1081_v2 }
 0xa2c   :  { %1135 = vmatpush.bf16.msra.mxu2 %v1082_v4  ;;  %1149 = vmatpush.bf16.msra.mxu1 %v2035_v29 }
 0xa2d   :  { %1163 = vmatpush.bf16.msra.mxu0 %v1083_v5 }
 0xa2f   :  { %1455 = vmatmul.msk.bf16.vlgmr.msra.gmra.mxu2 %vm179_vm8, %v1452_v6  ;;  %1150 = vmatmul.bf16.vlgmr.msra.gmra.mxu1 %v1448_v62 }
 0xa30   :  { %1456 = vmatmul.msk.bf16.vlgmr.msra.gmra.mxu0 %vm179_vm8, %v1452_v6 }
 0xa31   :  { %v1095_v14 = vpop.permute.xlu0 %1094 }
 0xa32   :  { %v1100_v17 = vpop.permute.xlu1 %1099 }
 0xaac   :  { %v1151_v9 = vpop.f32.mrf.mxu1 }
 0xaad   :  { %v1123_v11 = vpop.f32.mrf.mxu3  ;;  %v1165_v13 = vpop.f32.mrf.mxu0  ;;  %v1152_v16 = vadd.f32 %v1151_v9, %v1095_v14 }
 0xaae   :  { %v1124_v10 = vadd.f32 %v1123_v11, %v1095_v14 }
 0xaaf   :  { %v1166_v26 = vadd.f32 %v1165_v13, %v1152_v16  ;;  %v1465_v16 = vld [vmem:[%s2215_s1 + $0x68] sm:$0xf0] }
 0xab1   :  { %v1171_v27 = vmul.f32 %v1166_v26, %v1559_v8 }
 0xab2   :  { %v1137_v15 = vpop.f32.mrf.mxu2 }
 0xab3   :  { %v1138_v20 = vadd.f32 %v1137_v15, %v1124_v10  ;;  %v1485_v15 = vld [vmem:[%s2215_s1 + $0x64] sm:$0xf] }
 0xab4   :  { %v1153_v18 = vpop.f32.mrf.mxu1 }
 0xab5   :  { %v1154_v21 = vadd.f32 %v1153_v18, %v1100_v17  ;;  %v1125_v23 = vpop.f32.mrf.mxu3  ;;  %v1167_v22 = vpop.f32.mrf.mxu0  ;;  %v1170_v19 = vmul.f32 %v1138_v20, %v1557_v7  ;;  %v1463_v20 = vld [vmem:[%s2215_s1 + $0x60] sm:$0xf] }
 0xab6   :  { %v1126_v24 = vadd.f32 %v1125_v23, %v1100_v17  ;;  %v1468_v23 = vor.u32 %v1485_v15, %v1465_v16 }
 0xab7   :  { %v1168_v29 = vadd.f32 %v1167_v22, %v1154_v21  ;;  %v1174_v31 = vpack.c.bf16 %v1171_v27, %v1170_v19  ;;  %v1486_v21 = vld [vmem:[%s2215_s1 + $0x64] sm:$0xf0] }
 0xab8   :  { %v1464_v26 = vor.u32 %v1486_v21, %v1463_v20 }
 0xab9   :  { %v1173_v32 = vmul.f32 %v1168_v29, %v1559_v8  ;;  %v1178_v37 = vunpack.c.l.b16 %v1174_v31  ;;  %v1179_v36 = vunpack.c.h.b16 %v1174_v31 }
 0xaba   :  { %v1139_v25 = vpop.f32.mrf.mxu2 }
 0xabb   :  { %v1140_v28 = vadd.f32 %v1139_v25, %v1126_v24 }
 0xabd   :  { %v1172_v30 = vmul.f32 %v1140_v28, %v1557_v7 }
 0xabf   :  { %v1175_v33 = vpack.c.bf16 %v1173_v32, %v1172_v30 }
 0xac1   :  { %v1180_v34 = vunpack.c.l.b16 %v1175_v33  ;;  %v1181_v35 = vunpack.c.h.b16 %v1175_v33 }
 0xac3   :  { %v1183_v38 = vpack.c.b16 %v1181_v35, %v1179_v36  ;;  %v1182_v39 = vpack.c.b16 %v1180_v34, %v1178_v37 }
 0xac5   :  { %1186 = vrot.lane.b32.xlu0 %v1183_v38, %s1504_s30  ;;  %1184 = vrot.lane.b32.xlu2 %v1182_v39, %s1504_s30 }
 0xb1f   :  { %v2112_v40 = vpop.permute.xlu2 %1184 }
 0xb20   :  { %v1191_v41 = vsel %vm65_vm0, 0, %v2112_v40 }
 0xb21   :  { %1239 = vrot.lane.b32.xlu0 %v1191_v41, %s1505_s6  ;;  %1249 = vrot.lane.b32.xlu1 %v1191_v41, %s1506_s7 }
 0xb29   :  { %1229 = vrot.lane.b32.xlu0 %v1191_v41, %s1507_s8 }
 0xb37   :  { %v1187_v7 = vpop.permute.xlu0 %1186 }
 0xb38   :  { %v2121_v8 = vsel %vm65_vm0, %v2112_v40, %v1187_v7  ;;  %v1194_v42 = vsel %vm65_vm0, %v1187_v7, 0  ;;  %v1501_v7 = vld [vmem:[%s2213_s0 + $0x18] sm:$0xff] }
 0xb39   :  { %1233 = vrot.lane.b32.xlu0 %v1194_v42, %s1507_s8  ;;  %1241 = vrot.lane.b32.xlu1 %v2121_v8, %s1505_s6 }
 0xb3a   :  { %1251 = vrot.lane.b32.xlu2 %v2121_v8, %s1506_s7 }
 0xb41   :  { %1207 = vrot.lane.b32.xlu0 %v1191_v41, %s1509_s10  ;;  %1231 = vrot.lane.b32.xlu1 %v2121_v8, %s1507_s8 }
 0xb42   :  { %1253 = vrot.lane.b32.xlu2 %v1194_v42, %s1506_s7 }
 0xb49   :  { %1197 = vrot.lane.b32.xlu0 %v1191_v41, %s1510_s11  ;;  %1217 = vrot.lane.b32.xlu1 %v1191_v41, %s1508_s9 }
 0xb4a   :  { %1243 = vrot.lane.b32.xlu2 %v1194_v42, %s1505_s6 }
 0xb51   :  { %1201 = vrot.lane.b32.xlu0 %v1194_v42, %s1510_s11  ;;  %1209 = vrot.lane.b32.xlu1 %v2121_v8, %s1509_s10 }
 0xb52   :  { %1219 = vrot.lane.b32.xlu2 %v2121_v8, %s1508_s9 }
 0xb59   :  { %1263 = vrot.lane.b32.xlu0 %v1194_v42, %s1511_s12  ;;  %1199 = vrot.lane.b32.xlu1 %v2121_v8, %s1510_s11 }
 0xb5a   :  { %1221 = vrot.lane.b32.xlu2 %v1194_v42, %s1508_s9 }
 0xb61   :  { %1259 = vrot.lane.b32.xlu1 %v1191_v41, %s1511_s12 }
 0xb62   :  { %1211 = vrot.lane.b32.xlu2 %v1194_v42, %s1509_s10 }
 0xb69   :  { %1277 = vperm.xlu1 %1497, %v1459_v43  }
 0xb6a   :  { %1261 = vrot.lane.b32.xlu2 %v2121_v8, %s1511_s12 }
 0xb72   :  { %1282 = vperm.xlu2 %1498, %v1460_v44  }
 0xb93   :  { %v1250_v45 = vpop.permute.xlu1 %1249  ;;  %v1240_v49 = vpop.permute.xlu0 %1239 }
 0xb94   :  { %v1252_v47 = vpop.permute.xlu2 %1251 }
 0xb95   :  { %v1255_v48 = vsel %vm140_vm1, %v1250_v45, %v1252_v47 }
 0xb96   :  { %1297 = vmatpush.bf16.msrb.mxu2 %v1255_v48 }
 0xb9b   :  { %v1230_v52 = vpop.permute.xlu0 %1229 }
 0xb9c   :  { %v1254_v50 = vpop.permute.xlu2 %1253 }
 0xb9d   :  { %v1256_v51 = vsel %vm140_vm1, %v1252_v47, %v1254_v50  ;;  %v1502_v47 = vld [vmem:[%s2213_s0 + $0x10] sm:$0xff] }
 0xb9e   :  { %1325 = vmatpush.bf16.msrb.mxu0 %v1256_v51 }
 0xba4   :  { %v1244_v46 = vpop.permute.xlu2 %1243 }
 0xbab   :  { %v1234_v53 = vpop.permute.xlu0 %1233  ;;  %v1242_v54 = vpop.permute.xlu1 %1241 }
 0xbac   :  { %v1220_v55 = vpop.permute.xlu2 %1219  ;;  %v1245_v56 = vsel %vm129_vm2, %v1240_v49, %v1242_v54  ;;  %v1246_v57 = vsel %vm129_vm2, %v1242_v54, %v1244_v46 }
 0xbad   :  { %1298 = vmatpush.bf16.msrb.mxu2 %v1245_v56  ;;  %1326 = vmatpush.bf16.msrb.mxu0 %v1246_v57 }
 0xbb3   :  { %v1208_v58 = vpop.permute.xlu0 %1207  ;;  %v1232_v59 = vpop.permute.xlu1 %1231 }
 0xbb4   :  { %v1235_v60 = vsel %vm118_vm3, %v1230_v52, %v1232_v59  ;;  %v1236_v62 = vsel %vm118_vm3, %v1232_v59, %v1234_v53  ;;  %v1222_v63 = vpop.permute.xlu2 %1221 }
 0xbb5   :  { %1299 = vmatpush.bf16.msrb.mxu2 %v1235_v60  ;;  %1327 = vmatpush.bf16.msrb.mxu0 %v1236_v62  ;;  %v1224_v2 = vsel %vm105_vm4, %v1220_v55, %v1222_v63 }
 0xbb9   :  { %1300 = vmatpush.bf16.msrb.mxu2 %v1182_v39  ;;  %1328 = vmatpush.bf16.msrb.mxu0 %v1183_v38 }
 0xbbb   :  { %v1198_v61 = vpop.permute.xlu0 %1197  ;;  %v1218_v0 = vpop.permute.xlu1 %1217 }
 0xbbc   :  { %v1223_v1 = vsel %vm105_vm4, %v1218_v0, %v1220_v55  ;;  %v1212_v3 = vpop.permute.xlu2 %1211 }
 0xbbd   :  { %1301 = vmatpush.bf16.msrb.mxu2 %v1223_v1  ;;  %1329 = vmatpush.bf16.msrb.mxu0 %v1224_v2 }
 0xbc3   :  { %v1202_v4 = vpop.permute.xlu0 %1201  ;;  %v1210_v5 = vpop.permute.xlu1 %1209 }
 0xbc4   :  { %v1213_v6 = vsel %vm94_vm5, %v1208_v58, %v1210_v5  ;;  %v1214_v9 = vsel %vm94_vm5, %v1210_v5, %v1212_v3  ;;  %v1262_v11 = vpop.permute.xlu2 %1261 }
 0xbc5   :  { %1302 = vmatpush.bf16.msrb.mxu2 %v1213_v6  ;;  %1330 = vmatpush.bf16.msrb.mxu0 %v1214_v9 }
 0xbcb   :  { %v1264_v13 = vpop.permute.xlu0 %1263  ;;  %v1200_v14 = vpop.permute.xlu1 %1199 }
 0xbcc   :  { %v1266_v10 = vsel %vm151_vm7, %v1262_v11, %v1264_v13  ;;  %v1203_v17 = vsel %vm83_vm6, %v1198_v61, %v1200_v14  ;;  %v1204_v18 = vsel %vm83_vm6, %v1200_v14, %v1202_v4  ;;  %v1283_v30 = vpop.permute.xlu2 %1282 }
 0xbcd   :  { %1303 = vmatpush.bf16.msrb.mxu2 %v1203_v17  ;;  %1331 = vmatpush.bf16.msrb.mxu0 %v1204_v18 }
 0xbce   :  { %1346 = vmatpush.bf16.msrb.mxu1 %v1266_v10 }
 0xbd1   :  { %1470 = vmatpush.bf16.msk.msrb.mxu2 %vm1647_vm9, %v2112_v40  ;;  %1332 = vmatpush.bf16.msrb.mxu0 %v2121_v8  ;;  %v1500_v40 = vld [vmem:[%s2213_s0] sm:$0xff] }
 0xbd2   :  { %1472 = vmatmul.msk.bf16.vlgmr.msrb.gmra.mxu1 %vm179_vm8, %v1468_v23 }
 0xbd3   :  { %v1260_v22 = vpop.permute.xlu1 %1259 }
 0xbd4   :  { %v1265_v19 = vsel %vm151_vm7, %v1260_v22, %v1262_v11  ;;  %1305 = vmatmul.bf16.vlgmr.msrb.gmra.mxu2 %v1464_v26  ;;  %1333 = vmatmul.bf16.vlgmr.msrb.gmra.mxu0 %v1464_v26 }
 0xbd5   :  { %1318 = vmatpush.bf16.msrb.mxu3 %v1265_v19 }
 0xbd8   :  { %1471 = vmatmul.msk.bf16.vlgmr.msrb.gmra.mxu3 %vm179_vm8, %v1468_v23 }
 0xbdb   :  { %v1278_v24 = vpop.permute.xlu1 %1277 }
 0xc4f   :  { %v1348_v29 = vpop.f32.mrf.mxu1 }
 0xc51   :  { %v1334_v25 = vpop.f32.mrf.mxu0 }
 0xc52   :  { %v1335_v27 = vadd.f32 %v1334_v25, %v1278_v24 }
 0xc54   :  { %v1349_v28 = vadd.f32 %v1348_v29, %v1335_v27 }
 0xc56   :  { %v1354_v31 = vadd.f32 %v1499_v12, %v1349_v28 }
 0xc57   :  { %v1306_v32 = vpop.f32.mrf.mxu2  ;;  %v1350_v37 = vpop.f32.mrf.mxu1 }
 0xc58   :  { %1358 = vst [vmem:[%s2216_s5 + $0x8] sm:$0xff] %v1354_v31  ;;  %v1307_v36 = vadd.f32 %v1306_v32, %v1278_v24 }
 0xc59   :  { %v1336_v33 = vpop.f32.mrf.mxu0 }
 0xc5a   :  { %v1337_v34 = vadd.f32 %v1336_v33, %v1283_v30 }
 0xc5b   :  { %v1320_v35 = vpop.f32.mrf.mxu3 }
 0xc5c   :  { %v1321_v38 = vadd.f32 %v1320_v35, %v1307_v36  ;;  %v1351_v39 = vadd.f32 %v1350_v37, %v1337_v34 }
 0xc5e   :  { %v1353_v41 = vadd.f32 %v1500_v40, %v1321_v38  ;;  %v1356_v8 = vadd.f32 %v1501_v7, %v1351_v39 }
 0xc5f   :  { %v1308_v42 = vpop.f32.mrf.mxu2 }
 0xc60   :  { %1357 = vst [vmem:[%s2216_s5] sm:$0xff] %v1353_v41  ;;  %v1309_v43 = vadd.f32 %v1308_v42, %v1283_v30 }
 0xc61   :  { %1360 = vst [vmem:[%s2216_s5 + $0x18] sm:$0xff] %v1356_v8 }
 0xc63   :  { %v1322_v44 = vpop.f32.mrf.mxu3 }
 0xc64   :  { %v1323_v45 = vadd.f32 %v1322_v44, %v1309_v43 }
 0xc66   :  { %v1355_v48 = vadd.f32 %v1502_v47, %v1323_v45 }
 0xc68   :  { %1359 = vst [vmem:[%s2216_s5 + $0x10] sm:$0xff] %v1355_v48 }

</bundles_post_ra>
